<compile_context>
chip_gen: v7x
topology: tpu7x:2x2x1
jax: 0.10.0
libtpu: 0.0.40
codegen_flags: <defaults>
</compile_context>

<pallas_src>
import math
import jax
import jax.numpy as jnp
from jax.experimental import pallas as pl
from jax.experimental.pallas import tpu as pltpu

B = 2            # batch
S = 8            # decoder sequence length
S_ENC = 8        # encoder sequence length
D = 32           # d_model
H = 4            # attention heads
DK = D // H      # per-head dim
HID = 64         # feed-forward hidden dim
EPS = 1e-6
NEG_INF = -1e9

RQ = B * S       # folded decoder rows (queries / self-attn keys)
RE = B * S_ENC   # folded encoder rows (cross-attn keys/values)

# Packed parameter buffer: (128, 128) f32 = 64 KB (one DMA, densely packed).
#   rows  0: 32 : [ WQKV1 (96 lanes, q pre-scaled by 1/sqrt(dk)) | WO1 (32) ]
#   rows 32: 64 : [ WQ2 (32, pre-scaled) | WKV2 (64) | WO2 (32) ]
#   rows 64: 96 : W1 in lanes 0:64
#   rows 64:128 : W2 in lanes 64:96          (64 rows x 32 lanes)
#   row   96    : b1 in lanes 0:64
#   row   97    : b2 in lanes 0:32
P_ROWS = 128
P_LANES = 128


def decoder_block_kernel(act_ref, p_ref, out_ref):
    """Single-invocation decoder block.

    act_ref: (B*S, 2*D + B*S + B*S_ENC)  [ x | y | self_bias | cross_bias ]
    p_ref:   (128, 128)                  packed parameters (one DMA)
    out_ref: (B*S, D)
    """
    x = act_ref[:, 0:D]                              # (16, 32)
    y = act_ref[:, D:2 * D]                          # (16, 32)
    self_bias = act_ref[:, 2 * D:2 * D + RQ]         # (16, 16)
    cross_bias = act_ref[:, 2 * D + RQ:2 * D + RQ + RE]   # (16, 16)

    # --- packed parameters (static slices of the single VMEM buffer) ---
    wqkv1 = p_ref[0:D, 0:3 * D]                      # (32, 96)
    wo1 = p_ref[0:D, 3 * D:4 * D]                    # (32, 32)
    wq2 = p_ref[D:2 * D, 0:D]                        # (32, 32)
    wkv2 = p_ref[D:2 * D, D:3 * D]                   # (32, 64)
    wo2 = p_ref[D:2 * D, 3 * D:4 * D]                # (32, 32)
    w1 = p_ref[2 * D:3 * D, 0:HID]                   # (32, 64)
    w2 = p_ref[2 * D:4 * D, HID:HID + D]             # (64, 32)
    b1 = p_ref[3 * D:3 * D + 1, 0:HID]               # (1, 64)
    b2 = p_ref[3 * D + 1:3 * D + 2, 0:D]             # (1, 32)

    def layer_norm(z):
        # Custom LayerNorm: (z - mean) / (unbiased_std + eps); alpha=1, beta=0.
        # Exact divide (review correctness concern: keep LN reciprocal exact).
        mu = jnp.mean(z, axis=-1, keepdims=True)
        var = jnp.sum((z - mu) ** 2, axis=-1, keepdims=True) * (1.0 / (D - 1))
        return (z - mu) / (jnp.sqrt(var) + EPS)

    def attend(q, k, v, bias, w_o):
        # q: (RQ, D); k, v: (RK, D); bias: (RQ, RK) additive (0 / -1e9),
        # block-diagonal in batch so the packed 16-row attention equals
        # per-batch attention.  1/sqrt(dk) already folded into the q weights.
        qh = jnp.stack([q[:, h * DK:(h + 1) * DK] for h in range(H)], axis=0)
        kh = jnp.stack([k[:, h * DK:(h + 1) * DK] for h in range(H)], axis=0)
        vh = jnp.stack([v[:, h * DK:(h + 1) * DK] for h in range(H)], axis=0)
        s = jnp.einsum('hqd,hkd->hqk', qh, kh,
                       preferred_element_type=jnp.float32) + bias[None, :, :]
        m = jnp.max(s, axis=-1, keepdims=True)
        e = jnp.exp(s - m)
        p = e / jnp.sum(e, axis=-1, keepdims=True)          # exact softmax
        ctx = jnp.einsum('hqk,hkd->hqd', p, vh,
                         preferred_element_type=jnp.float32)  # (H, RQ, DK)
        # In-register re-assembly of the heads (no VMEM scratch roundtrip),
        # then ONE output projection.
        ctx_flat = jnp.concatenate([ctx[h] for h in range(H)], axis=-1)  # (RQ, D)
        return jnp.dot(ctx_flat, w_o, preferred_element_type=jnp.float32)

    # residual 1: self-attention over layer-normed x (q = k = v = norm(x))
    n1 = layer_norm(x)
    qkv = jnp.dot(n1, wqkv1, preferred_element_type=jnp.float32)        # (16, 96)
    h1 = x + attend(qkv[:, 0:D], qkv[:, D:2 * D], qkv[:, 2 * D:3 * D],
                    self_bias, wo1)

    # residual 2: cross-attention (q = norm(h1); k = v = raw encoder output y)
    n2 = layer_norm(h1)
    q2 = jnp.dot(n2, wq2, preferred_element_type=jnp.float32)           # (16, 32)
    kv = jnp.dot(y, wkv2, preferred_element_type=jnp.float32)           # (16, 64)
    h2 = h1 + attend(q2, kv[:, 0:D], kv[:, D:2 * D], cross_bias, wo2)

    # residual 3: feed-forward (linear -> relu -> linear)
    n3 = layer_norm(h2)
    f = jnp.maximum(jnp.dot(n3, w1, preferred_element_type=jnp.float32) + b1, 0.0)
    f = jnp.dot(f, w2, preferred_element_type=jnp.float32) + b2

    # Output stays the folded (16, 32) tile; lane-dense relayout is gated on
    # the consumer layout per the review.
    out_ref[...] = h2 + f


def _pack_params(params):
    """Pack the 12 parameter tensors into one dense (128, 128) f32 buffer.

    Called ONCE per weight update, outside the per-call jitted path.
    """
    (wq1, wk1, wv1, wo1, wq2, wk2, wv2, wo2, w1, b1, w2, b2) = params
    scale = 1.0 / math.sqrt(DK)   # folded into the q projections
    buf = jnp.zeros((P_ROWS, P_LANES), jnp.float32)
    buf = buf.at[0:D, 0:3 * D].set(
        jnp.concatenate([wq1 * scale, wk1, wv1], axis=1))
    buf = buf.at[0:D, 3 * D:4 * D].set(wo1)
    buf = buf.at[D:2 * D, 0:D].set(wq2 * scale)
    buf = buf.at[D:2 * D, D:3 * D].set(jnp.concatenate([wk2, wv2], axis=1))
    buf = buf.at[D:2 * D, 3 * D:4 * D].set(wo2)
    buf = buf.at[2 * D:3 * D, 0:HID].set(w1)
    buf = buf.at[2 * D:4 * D, HID:HID + D].set(w2)
    buf = buf.at[3 * D:3 * D + 1, 0:HID].set(b1.reshape(1, HID))
    buf = buf.at[3 * D + 1:3 * D + 2, 0:D].set(b2.reshape(1, D))
    return buf


def _build_bias(dmask, emask):
    """Additive attention biases for the batch-packed kernel.

    0 where attending is allowed, -1e9 otherwise.  Cross-batch (b != b') blocks
    are always -1e9, so one packed (B*S)-row attention equals per-batch
    attention exactly (exp(-1e9 - m) underflows to 0).  Built ONCE per mask
    pattern, outside the per-call jitted path.
    """
    same_b = jnp.arange(B)[:, None] == jnp.arange(B)[None, :]           # (B, B)
    keep_s = same_b[:, None, :, None] & (dmask[:, 0][:, :, None, :] != 0.0)
    keep_c = same_b[:, None, :, None] & (emask[:, 0][:, :, None, :] != 0.0)
    self_bias = jnp.where(keep_s, 0.0, NEG_INF).reshape(RQ, RQ)
    cross_bias = jnp.where(keep_c, 0.0, NEG_INF).reshape(RQ, RE)
    return jnp.concatenate([self_bias, cross_bias], axis=1).astype(jnp.float32)


@jax.jit
def decoder_block(x, y, bias, packed):
    # One concat merges the three per-call tensors into a single DMA'd buffer
    # (valid because B*S == B*S_ENC here; rows would need padding otherwise).
    act = jnp.concatenate([x.reshape(RQ, D), y.reshape(RE, D), bias], axis=1)
    vmem_spec = pl.BlockSpec(memory_space=pltpu.MemorySpace.VMEM)
    out = pl.pallas_call(
        decoder_block_kernel,
        out_shape=jax.ShapeDtypeStruct((RQ, D), jnp.float32),
        in_specs=[vmem_spec, vmem_spec],
        out_specs=vmem_spec,
    )(act, packed)
    return out.reshape(B, S, D)


def reference(x, y, dmask, emask, params):
    """Pure-JAX reference mirroring the PyTorch DecoderBlock (dropout = identity)."""
    (wq1, wk1, wv1, wo1, wq2, wk2, wv2, wo2, w1, b1, w2, b2) = params

    def ln(z):
        mu = jnp.mean(z, axis=-1, keepdims=True)
        var = jnp.sum((z - mu) ** 2, axis=-1, keepdims=True) / (z.shape[-1] - 1)
        return (z - mu) / (jnp.sqrt(var) + EPS)

    def mha(xq, xkv, mask, wq, wk, wv, wo):
        bsz, sq, _ = xq.shape
        sk = xkv.shape[1]
        q = (xq @ wq).reshape(bsz, sq, H, DK).transpose(0, 2, 1, 3)
        k = (xkv @ wk).reshape(bsz, sk, H, DK).transpose(0, 2, 1, 3)
        v = (xkv @ wv).reshape(bsz, sk, H, DK).transpose(0, 2, 1, 3)
        s = jnp.einsum('bhqd,bhkd->bhqk', q, k) / math.sqrt(DK)
        s = jnp.where(mask == 0.0, NEG_INF, s)
        p = jax.nn.softmax(s, axis=-1)
        o = jnp.einsum('bhqk,bhkd->bhqd', p, v).transpose(0, 2, 1, 3).reshape(bsz, sq, D)
        return o @ wo

    h1 = x + mha(ln(x), ln(x), dmask, wq1, wk1, wv1, wo1)
    h2 = h1 + mha(ln(h1), y, emask, wq2, wk2, wv2, wo2)
    f = jnp.maximum(ln(h2) @ w1 + b1, 0.0) @ w2 + b2
    return h2 + f


if __name__ == "__main__":
    key = jax.random.PRNGKey(0)
    keys = jax.random.split(key, 16)

    x = jax.random.normal(keys[0], (B, S, D), jnp.float32)
    y = jax.random.normal(keys[1], (B, S_ENC, D), jnp.float32)

    # decoder mask: causal; encoder mask: last 2 encoder positions padded out.
    dmask = jnp.broadcast_to(jnp.tril(jnp.ones((S, S), jnp.float32)), (B, 1, S, S))
    emask = jnp.ones((B, 1, S, S_ENC), jnp.float32).at[:, :, :, S_ENC - 2:].set(0.0)

    def init_w(k, shape, fan_in):
        return jax.random.normal(k, shape, jnp.float32) / math.sqrt(fan_in)

    params = (
        # self-attention projections (no bias)
        init_w(keys[2], (D, D), D), init_w(keys[3], (D, D), D),
        init_w(keys[4], (D, D), D), init_w(keys[5], (D, D), D),
        # cross-attention projections (no bias)
        init_w(keys[6], (D, D), D), init_w(keys[7], (D, D), D),
        init_w(keys[8], (D, D), D), init_w(keys[9], (D, D), D),
        # feed-forward: W1 (D,HID), b1 (1,HID), W2 (HID,D), b2 (1,D)
        init_w(keys[10], (D, HID), D), init_w(keys[11], (1, HID), 1),
        init_w(keys[12], (HID, D), HID), init_w(keys[13], (1, D), 1),
    )

    # Hoisted out of the per-call path (review): pack once, build bias once.
    packed = _pack_params(params)
    bias = _build_bias(dmask, emask)

    out = decoder_block(x, y, bias, packed)
    out = jax.block_until_ready(out)

    ref = reference(x, y, dmask, emask, params)
    assert out.shape == (B, S, D)
    max_err = float(jnp.max(jnp.abs(out - ref)))
    # Exact reciprocals everywhere => ~1e-5 agreement expected; 1e-3 tolerance.
    assert max_err < 1e-3, f"max abs err {max_err}"
    print("KERNEL_OK")
</pallas_src>

<mosaic_0001>
module attributes {stable_mosaic.version = 11 : i64} {
  func.func @decoder_block_kernel(%arg0: memref<16x96xf32, #tpu.memory_space<vmem>>, %arg1: memref<128x128xf32, #tpu.memory_space<vmem>>, %arg2: memref<16x32xf32, #tpu.memory_space<vmem>>) attributes {dimension_semantics = [], scalar_prefetch = 0 : i64, scratch_operands = 0 : i64, tpu.core_type = #tpu.core_type<tc>} {
    %c0 = arith.constant 0 : index
    %c0_0 = arith.constant 0 : index
    %0 = vector.load %arg0[%c0, %c0_0] : memref<16x96xf32, #tpu.memory_space<vmem>>, vector<16x32xf32>
    %c0_1 = arith.constant 0 : index
    %c32 = arith.constant 32 : index
    %1 = vector.load %arg0[%c0_1, %c32] : memref<16x96xf32, #tpu.memory_space<vmem>>, vector<16x32xf32>
    %c0_2 = arith.constant 0 : index
    %c64 = arith.constant 64 : index
    %2 = vector.load %arg0[%c0_2, %c64] : memref<16x96xf32, #tpu.memory_space<vmem>>, vector<16x16xf32>
    %c0_3 = arith.constant 0 : index
    %c80 = arith.constant 80 : index
    %3 = vector.load %arg0[%c0_3, %c80] : memref<16x96xf32, #tpu.memory_space<vmem>>, vector<16x16xf32>
    %c0_4 = arith.constant 0 : index
    %c0_5 = arith.constant 0 : index
    %4 = vector.load %arg1[%c0_4, %c0_5] : memref<128x128xf32, #tpu.memory_space<vmem>>, vector<32x96xf32>
    %c0_6 = arith.constant 0 : index
    %c96 = arith.constant 96 : index
    %5 = vector.load %arg1[%c0_6, %c96] : memref<128x128xf32, #tpu.memory_space<vmem>>, vector<32x32xf32>
    %c32_7 = arith.constant 32 : index
    %c0_8 = arith.constant 0 : index
    %6 = vector.load %arg1[%c32_7, %c0_8] : memref<128x128xf32, #tpu.memory_space<vmem>>, vector<32x32xf32>
    %c32_9 = arith.constant 32 : index
    %c32_10 = arith.constant 32 : index
    %7 = vector.load %arg1[%c32_9, %c32_10] : memref<128x128xf32, #tpu.memory_space<vmem>>, vector<32x64xf32>
    %c32_11 = arith.constant 32 : index
    %c96_12 = arith.constant 96 : index
    %8 = vector.load %arg1[%c32_11, %c96_12] : memref<128x128xf32, #tpu.memory_space<vmem>>, vector<32x32xf32>
    %c64_13 = arith.constant 64 : index
    %c0_14 = arith.constant 0 : index
    %9 = vector.load %arg1[%c64_13, %c0_14] : memref<128x128xf32, #tpu.memory_space<vmem>>, vector<32x64xf32>
    %c64_15 = arith.constant 64 : index
    %c64_16 = arith.constant 64 : index
    %10 = vector.load %arg1[%c64_15, %c64_16] : memref<128x128xf32, #tpu.memory_space<vmem>>, vector<64x32xf32>
    %c96_17 = arith.constant 96 : index
    %c0_18 = arith.constant 0 : index
    %11 = vector.load %arg1[%c96_17, %c0_18] : memref<128x128xf32, #tpu.memory_space<vmem>>, vector<1x64xf32>
    %c97 = arith.constant 97 : index
    %c0_19 = arith.constant 0 : index
    %12 = vector.load %arg1[%c97, %c0_19] : memref<128x128xf32, #tpu.memory_space<vmem>>, vector<1x32xf32>
    %cst = arith.constant dense<0.000000e+00> : vector<16xf32>
    %13 = vector.multi_reduction <add>, %0, %cst [1] : vector<16x32xf32> to vector<16xf32>
    %14 = vector.shape_cast %13 : vector<16xf32> to vector<16x1xf32>
    %cst_20 = arith.constant 3.200000e+01 : f32
    %15 = vector.broadcast %cst_20 : f32 to vector<16x1xf32>
    %16 = arith.divf %14, %15 : vector<16x1xf32>
    %17 = vector.broadcast %16 : vector<16x1xf32> to vector<16x32xf32>
    %18 = arith.subf %0, %17 : vector<16x32xf32>
    %19 = arith.mulf %18, %18 : vector<16x32xf32>
    %cst_21 = arith.constant dense<0.000000e+00> : vector<16xf32>
    %20 = vector.multi_reduction <add>, %19, %cst_21 [1] : vector<16x32xf32> to vector<16xf32>
    %21 = vector.shape_cast %20 : vector<16xf32> to vector<16x1xf32>
    %cst_22 = arith.constant 0.0322580636 : f32
    %22 = vector.broadcast %cst_22 : f32 to vector<16x1xf32>
    %23 = arith.mulf %21, %22 : vector<16x1xf32>
    %24 = vector.broadcast %16 : vector<16x1xf32> to vector<16x32xf32>
    %25 = arith.subf %0, %24 : vector<16x32xf32>
    %26 = math.sqrt %23 : vector<16x1xf32>
    %cst_23 = arith.constant 9.99999997E-7 : f32
    %27 = vector.broadcast %cst_23 : f32 to vector<16x1xf32>
    %28 = arith.addf %26, %27 : vector<16x1xf32>
    %29 = vector.broadcast %28 : vector<16x1xf32> to vector<16x32xf32>
    %30 = arith.divf %25, %29 : vector<16x32xf32>
    %cst_24 = arith.constant dense<0.000000e+00> : vector<16x96xf32>
    %31 = tpu.matmul %30, %4, %cst_24 {dimension_numbers = #tpu.dot_dimension_numbers<[1], [0], [0], [1], [0, 0, 1, 1], [], []>} : vector<16x32xf32>, vector<32x96xf32>, vector<16x96xf32> -> vector<16x96xf32>
    %32 = vector.extract_strided_slice %31 {offsets = [0, 0], sizes = [16, 32], strides = [1, 1]} : vector<16x96xf32> to vector<16x32xf32>
    %33 = vector.extract_strided_slice %31 {offsets = [0, 32], sizes = [16, 32], strides = [1, 1]} : vector<16x96xf32> to vector<16x32xf32>
    %34 = vector.extract_strided_slice %31 {offsets = [0, 64], sizes = [16, 32], strides = [1, 1]} : vector<16x96xf32> to vector<16x32xf32>
    %35 = vector.extract_strided_slice %32 {offsets = [0, 0], sizes = [16, 8], strides = [1, 1]} : vector<16x32xf32> to vector<16x8xf32>
    %36 = vector.extract_strided_slice %32 {offsets = [0, 8], sizes = [16, 8], strides = [1, 1]} : vector<16x32xf32> to vector<16x8xf32>
    %37 = vector.extract_strided_slice %32 {offsets = [0, 16], sizes = [16, 8], strides = [1, 1]} : vector<16x32xf32> to vector<16x8xf32>
    %38 = vector.extract_strided_slice %32 {offsets = [0, 24], sizes = [16, 8], strides = [1, 1]} : vector<16x32xf32> to vector<16x8xf32>
    %39 = vector.shape_cast %35 : vector<16x8xf32> to vector<1x16x8xf32>
    %40 = vector.shape_cast %36 : vector<16x8xf32> to vector<1x16x8xf32>
    %41 = vector.shape_cast %37 : vector<16x8xf32> to vector<1x16x8xf32>
    %42 = vector.shape_cast %38 : vector<16x8xf32> to vector<1x16x8xf32>
    %43 = tpu.concatenate %39, %40, %41, %42 in 0 : vector<1x16x8xf32>, vector<1x16x8xf32>, vector<1x16x8xf32>, vector<1x16x8xf32> -> vector<4x16x8xf32>
    %44 = vector.extract_strided_slice %33 {offsets = [0, 0], sizes = [16, 8], strides = [1, 1]} : vector<16x32xf32> to vector<16x8xf32>
    %45 = vector.extract_strided_slice %33 {offsets = [0, 8], sizes = [16, 8], strides = [1, 1]} : vector<16x32xf32> to vector<16x8xf32>
    %46 = vector.extract_strided_slice %33 {offsets = [0, 16], sizes = [16, 8], strides = [1, 1]} : vector<16x32xf32> to vector<16x8xf32>
    %47 = vector.extract_strided_slice %33 {offsets = [0, 24], sizes = [16, 8], strides = [1, 1]} : vector<16x32xf32> to vector<16x8xf32>
    %48 = vector.shape_cast %44 : vector<16x8xf32> to vector<1x16x8xf32>
    %49 = vector.shape_cast %45 : vector<16x8xf32> to vector<1x16x8xf32>
    %50 = vector.shape_cast %46 : vector<16x8xf32> to vector<1x16x8xf32>
    %51 = vector.shape_cast %47 : vector<16x8xf32> to vector<1x16x8xf32>
    %52 = tpu.concatenate %48, %49, %50, %51 in 0 : vector<1x16x8xf32>, vector<1x16x8xf32>, vector<1x16x8xf32>, vector<1x16x8xf32> -> vector<4x16x8xf32>
    %53 = vector.extract_strided_slice %34 {offsets = [0, 0], sizes = [16, 8], strides = [1, 1]} : vector<16x32xf32> to vector<16x8xf32>
    %54 = vector.extract_strided_slice %34 {offsets = [0, 8], sizes = [16, 8], strides = [1, 1]} : vector<16x32xf32> to vector<16x8xf32>
    %55 = vector.extract_strided_slice %34 {offsets = [0, 16], sizes = [16, 8], strides = [1, 1]} : vector<16x32xf32> to vector<16x8xf32>
    %56 = vector.extract_strided_slice %34 {offsets = [0, 24], sizes = [16, 8], strides = [1, 1]} : vector<16x32xf32> to vector<16x8xf32>
    %57 = vector.shape_cast %53 : vector<16x8xf32> to vector<1x16x8xf32>
    %58 = vector.shape_cast %54 : vector<16x8xf32> to vector<1x16x8xf32>
    %59 = vector.shape_cast %55 : vector<16x8xf32> to vector<1x16x8xf32>
    %60 = vector.shape_cast %56 : vector<16x8xf32> to vector<1x16x8xf32>
    %61 = tpu.concatenate %57, %58, %59, %60 in 0 : vector<1x16x8xf32>, vector<1x16x8xf32>, vector<1x16x8xf32>, vector<1x16x8xf32> -> vector<4x16x8xf32>
    "tpu.trace_start"() <{level = 10 : i32, message = "hqd,hkd->hqk"}> : () -> ()
    %cst_25 = arith.constant dense<0.000000e+00> : vector<4x16x16xf32>
    %62 = tpu.matmul %43, %52, %cst_25 {dimension_numbers = #tpu.dot_dimension_numbers<[2], [2], [1], [1], [0, 0, 0, 1, 1, 1], [0], [0]>} : vector<4x16x8xf32>, vector<4x16x8xf32>, vector<4x16x16xf32> -> vector<4x16x16xf32>
    "tpu.trace_stop"() : () -> ()
    %63 = vector.shape_cast %2 : vector<16x16xf32> to vector<1x16x16xf32>
    %64 = vector.broadcast %63 : vector<1x16x16xf32> to vector<4x16x16xf32>
    %65 = arith.addf %62, %64 : vector<4x16x16xf32>
    %cst_26 = arith.constant dense<0xFF800000> : vector<4x16xf32>
    %66 = vector.multi_reduction <maximumf>, %65, %cst_26 [2] : vector<4x16x16xf32> to vector<4x16xf32>
    %67 = vector.shape_cast %66 : vector<4x16xf32> to vector<4x16x1xf32>
    %68 = vector.broadcast %67 : vector<4x16x1xf32> to vector<4x16x16xf32>
    %69 = arith.subf %65, %68 : vector<4x16x16xf32>
    %70 = math.exp %69 : vector<4x16x16xf32>
    %cst_27 = arith.constant dense<0.000000e+00> : vector<4x16xf32>
    %71 = vector.multi_reduction <add>, %70, %cst_27 [2] : vector<4x16x16xf32> to vector<4x16xf32>
    %72 = vector.shape_cast %71 : vector<4x16xf32> to vector<4x16x1xf32>
    %73 = vector.broadcast %72 : vector<4x16x1xf32> to vector<4x16x16xf32>
    %74 = arith.divf %70, %73 : vector<4x16x16xf32>
    "tpu.trace_start"() <{level = 10 : i32, message = "hqk,hkd->hqd"}> : () -> ()
    %cst_28 = arith.constant dense<0.000000e+00> : vector<4x16x8xf32>
    %75 = tpu.matmul %74, %61, %cst_28 {dimension_numbers = #tpu.dot_dimension_numbers<[2], [1], [1], [2], [0, 0, 0, 1, 1, 2], [0], [0]>} : vector<4x16x16xf32>, vector<4x16x8xf32>, vector<4x16x8xf32> -> vector<4x16x8xf32>
    "tpu.trace_stop"() : () -> ()
    %76 = vector.extract_strided_slice %75 {offsets = [0, 0, 0], sizes = [1, 16, 8], strides = [1, 1, 1]} : vector<4x16x8xf32> to vector<1x16x8xf32>
    %77 = vector.shape_cast %76 : vector<1x16x8xf32> to vector<16x8xf32>
    %78 = vector.extract_strided_slice %75 {offsets = [1, 0, 0], sizes = [1, 16, 8], strides = [1, 1, 1]} : vector<4x16x8xf32> to vector<1x16x8xf32>
    %79 = vector.shape_cast %78 : vector<1x16x8xf32> to vector<16x8xf32>
    %80 = vector.extract_strided_slice %75 {offsets = [2, 0, 0], sizes = [1, 16, 8], strides = [1, 1, 1]} : vector<4x16x8xf32> to vector<1x16x8xf32>
    %81 = vector.shape_cast %80 : vector<1x16x8xf32> to vector<16x8xf32>
    %82 = vector.extract_strided_slice %75 {offsets = [3, 0, 0], sizes = [1, 16, 8], strides = [1, 1, 1]} : vector<4x16x8xf32> to vector<1x16x8xf32>
    %83 = vector.shape_cast %82 : vector<1x16x8xf32> to vector<16x8xf32>
    %84 = tpu.concatenate %77, %79, %81, %83 in 1 : vector<16x8xf32>, vector<16x8xf32>, vector<16x8xf32>, vector<16x8xf32> -> vector<16x32xf32>
    %cst_29 = arith.constant dense<0.000000e+00> : vector<16x32xf32>
    %85 = tpu.matmul %84, %5, %cst_29 {dimension_numbers = #tpu.dot_dimension_numbers<[1], [0], [0], [1], [0, 0, 1, 1], [], []>} : vector<16x32xf32>, vector<32x32xf32>, vector<16x32xf32> -> vector<16x32xf32>
    %86 = arith.addf %0, %85 : vector<16x32xf32>
    %cst_30 = arith.constant dense<0.000000e+00> : vector<16xf32>
    %87 = vector.multi_reduction <add>, %86, %cst_30 [1] : vector<16x32xf32> to vector<16xf32>
    %88 = vector.shape_cast %87 : vector<16xf32> to vector<16x1xf32>
    %cst_31 = arith.constant 3.200000e+01 : f32
    %89 = vector.broadcast %cst_31 : f32 to vector<16x1xf32>
    %90 = arith.divf %88, %89 : vector<16x1xf32>
    %91 = vector.broadcast %90 : vector<16x1xf32> to vector<16x32xf32>
    %92 = arith.subf %86, %91 : vector<16x32xf32>
    %93 = arith.mulf %92, %92 : vector<16x32xf32>
    %cst_32 = arith.constant dense<0.000000e+00> : vector<16xf32>
    %94 = vector.multi_reduction <add>, %93, %cst_32 [1] : vector<16x32xf32> to vector<16xf32>
    %95 = vector.shape_cast %94 : vector<16xf32> to vector<16x1xf32>
    %cst_33 = arith.constant 0.0322580636 : f32
    %96 = vector.broadcast %cst_33 : f32 to vector<16x1xf32>
    %97 = arith.mulf %95, %96 : vector<16x1xf32>
    %98 = vector.broadcast %90 : vector<16x1xf32> to vector<16x32xf32>
    %99 = arith.subf %86, %98 : vector<16x32xf32>
    %100 = math.sqrt %97 : vector<16x1xf32>
    %cst_34 = arith.constant 9.99999997E-7 : f32
    %101 = vector.broadcast %cst_34 : f32 to vector<16x1xf32>
    %102 = arith.addf %100, %101 : vector<16x1xf32>
    %103 = vector.broadcast %102 : vector<16x1xf32> to vector<16x32xf32>
    %104 = arith.divf %99, %103 : vector<16x32xf32>
    %cst_35 = arith.constant dense<0.000000e+00> : vector<16x32xf32>
    %105 = tpu.matmul %104, %6, %cst_35 {dimension_numbers = #tpu.dot_dimension_numbers<[1], [0], [0], [1], [0, 0, 1, 1], [], []>} : vector<16x32xf32>, vector<32x32xf32>, vector<16x32xf32> -> vector<16x32xf32>
    %cst_36 = arith.constant dense<0.000000e+00> : vector<16x64xf32>
    %106 = tpu.matmul %1, %7, %cst_36 {dimension_numbers = #tpu.dot_dimension_numbers<[1], [0], [0], [1], [0, 0, 1, 1], [], []>} : vector<16x32xf32>, vector<32x64xf32>, vector<16x64xf32> -> vector<16x64xf32>
    %107 = vector.extract_strided_slice %106 {offsets = [0, 0], sizes = [16, 32], strides = [1, 1]} : vector<16x64xf32> to vector<16x32xf32>
    %108 = vector.extract_strided_slice %106 {offsets = [0, 32], sizes = [16, 32], strides = [1, 1]} : vector<16x64xf32> to vector<16x32xf32>
    %109 = vector.extract_strided_slice %105 {offsets = [0, 0], sizes = [16, 8], strides = [1, 1]} : vector<16x32xf32> to vector<16x8xf32>
    %110 = vector.extract_strided_slice %105 {offsets = [0, 8], sizes = [16, 8], strides = [1, 1]} : vector<16x32xf32> to vector<16x8xf32>
    %111 = vector.extract_strided_slice %105 {offsets = [0, 16], sizes = [16, 8], strides = [1, 1]} : vector<16x32xf32> to vector<16x8xf32>
    %112 = vector.extract_strided_slice %105 {offsets = [0, 24], sizes = [16, 8], strides = [1, 1]} : vector<16x32xf32> to vector<16x8xf32>
    %113 = vector.shape_cast %109 : vector<16x8xf32> to vector<1x16x8xf32>
    %114 = vector.shape_cast %110 : vector<16x8xf32> to vector<1x16x8xf32>
    %115 = vector.shape_cast %111 : vector<16x8xf32> to vector<1x16x8xf32>
    %116 = vector.shape_cast %112 : vector<16x8xf32> to vector<1x16x8xf32>
    %117 = tpu.concatenate %113, %114, %115, %116 in 0 : vector<1x16x8xf32>, vector<1x16x8xf32>, vector<1x16x8xf32>, vector<1x16x8xf32> -> vector<4x16x8xf32>
    %118 = vector.extract_strided_slice %107 {offsets = [0, 0], sizes = [16, 8], strides = [1, 1]} : vector<16x32xf32> to vector<16x8xf32>
    %119 = vector.extract_strided_slice %107 {offsets = [0, 8], sizes = [16, 8], strides = [1, 1]} : vector<16x32xf32> to vector<16x8xf32>
    %120 = vector.extract_strided_slice %107 {offsets = [0, 16], sizes = [16, 8], strides = [1, 1]} : vector<16x32xf32> to vector<16x8xf32>
    %121 = vector.extract_strided_slice %107 {offsets = [0, 24], sizes = [16, 8], strides = [1, 1]} : vector<16x32xf32> to vector<16x8xf32>
    %122 = vector.shape_cast %118 : vector<16x8xf32> to vector<1x16x8xf32>
    %123 = vector.shape_cast %119 : vector<16x8xf32> to vector<1x16x8xf32>
    %124 = vector.shape_cast %120 : vector<16x8xf32> to vector<1x16x8xf32>
    %125 = vector.shape_cast %121 : vector<16x8xf32> to vector<1x16x8xf32>
    %126 = tpu.concatenate %122, %123, %124, %125 in 0 : vector<1x16x8xf32>, vector<1x16x8xf32>, vector<1x16x8xf32>, vector<1x16x8xf32> -> vector<4x16x8xf32>
    %127 = vector.extract_strided_slice %108 {offsets = [0, 0], sizes = [16, 8], strides = [1, 1]} : vector<16x32xf32> to vector<16x8xf32>
    %128 = vector.extract_strided_slice %108 {offsets = [0, 8], sizes = [16, 8], strides = [1, 1]} : vector<16x32xf32> to vector<16x8xf32>
    %129 = vector.extract_strided_slice %108 {offsets = [0, 16], sizes = [16, 8], strides = [1, 1]} : vector<16x32xf32> to vector<16x8xf32>
    %130 = vector.extract_strided_slice %108 {offsets = [0, 24], sizes = [16, 8], strides = [1, 1]} : vector<16x32xf32> to vector<16x8xf32>
    %131 = vector.shape_cast %127 : vector<16x8xf32> to vector<1x16x8xf32>
    %132 = vector.shape_cast %128 : vector<16x8xf32> to vector<1x16x8xf32>
    %133 = vector.shape_cast %129 : vector<16x8xf32> to vector<1x16x8xf32>
    %134 = vector.shape_cast %130 : vector<16x8xf32> to vector<1x16x8xf32>
    %135 = tpu.concatenate %131, %132, %133, %134 in 0 : vector<1x16x8xf32>, vector<1x16x8xf32>, vector<1x16x8xf32>, vector<1x16x8xf32> -> vector<4x16x8xf32>
    "tpu.trace_start"() <{level = 10 : i32, message = "hqd,hkd->hqk"}> : () -> ()
    %cst_37 = arith.constant dense<0.000000e+00> : vector<4x16x16xf32>
    %136 = tpu.matmul %117, %126, %cst_37 {dimension_numbers = #tpu.dot_dimension_numbers<[2], [2], [1], [1], [0, 0, 0, 1, 1, 1], [0], [0]>} : vector<4x16x8xf32>, vector<4x16x8xf32>, vector<4x16x16xf32> -> vector<4x16x16xf32>
    "tpu.trace_stop"() : () -> ()
    %137 = vector.shape_cast %3 : vector<16x16xf32> to vector<1x16x16xf32>
    %138 = vector.broadcast %137 : vector<1x16x16xf32> to vector<4x16x16xf32>
    %139 = arith.addf %136, %138 : vector<4x16x16xf32>
    %cst_38 = arith.constant dense<0xFF800000> : vector<4x16xf32>
    %140 = vector.multi_reduction <maximumf>, %139, %cst_38 [2] : vector<4x16x16xf32> to vector<4x16xf32>
    %141 = vector.shape_cast %140 : vector<4x16xf32> to vector<4x16x1xf32>
    %142 = vector.broadcast %141 : vector<4x16x1xf32> to vector<4x16x16xf32>
    %143 = arith.subf %139, %142 : vector<4x16x16xf32>
    %144 = math.exp %143 : vector<4x16x16xf32>
    %cst_39 = arith.constant dense<0.000000e+00> : vector<4x16xf32>
    %145 = vector.multi_reduction <add>, %144, %cst_39 [2] : vector<4x16x16xf32> to vector<4x16xf32>
    %146 = vector.shape_cast %145 : vector<4x16xf32> to vector<4x16x1xf32>
    %147 = vector.broadcast %146 : vector<4x16x1xf32> to vector<4x16x16xf32>
    %148 = arith.divf %144, %147 : vector<4x16x16xf32>
    "tpu.trace_start"() <{level = 10 : i32, message = "hqk,hkd->hqd"}> : () -> ()
    %cst_40 = arith.constant dense<0.000000e+00> : vector<4x16x8xf32>
    %149 = tpu.matmul %148, %135, %cst_40 {dimension_numbers = #tpu.dot_dimension_numbers<[2], [1], [1], [2], [0, 0, 0, 1, 1, 2], [0], [0]>} : vector<4x16x16xf32>, vector<4x16x8xf32>, vector<4x16x8xf32> -> vector<4x16x8xf32>
    "tpu.trace_stop"() : () -> ()
    %150 = vector.extract_strided_slice %149 {offsets = [0, 0, 0], sizes = [1, 16, 8], strides = [1, 1, 1]} : vector<4x16x8xf32> to vector<1x16x8xf32>
    %151 = vector.shape_cast %150 : vector<1x16x8xf32> to vector<16x8xf32>
    %152 = vector.extract_strided_slice %149 {offsets = [1, 0, 0], sizes = [1, 16, 8], strides = [1, 1, 1]} : vector<4x16x8xf32> to vector<1x16x8xf32>
    %153 = vector.shape_cast %152 : vector<1x16x8xf32> to vector<16x8xf32>
    %154 = vector.extract_strided_slice %149 {offsets = [2, 0, 0], sizes = [1, 16, 8], strides = [1, 1, 1]} : vector<4x16x8xf32> to vector<1x16x8xf32>
    %155 = vector.shape_cast %154 : vector<1x16x8xf32> to vector<16x8xf32>
    %156 = vector.extract_strided_slice %149 {offsets = [3, 0, 0], sizes = [1, 16, 8], strides = [1, 1, 1]} : vector<4x16x8xf32> to vector<1x16x8xf32>
    %157 = vector.shape_cast %156 : vector<1x16x8xf32> to vector<16x8xf32>
    %158 = tpu.concatenate %151, %153, %155, %157 in 1 : vector<16x8xf32>, vector<16x8xf32>, vector<16x8xf32>, vector<16x8xf32> -> vector<16x32xf32>
    %cst_41 = arith.constant dense<0.000000e+00> : vector<16x32xf32>
    %159 = tpu.matmul %158, %8, %cst_41 {dimension_numbers = #tpu.dot_dimension_numbers<[1], [0], [0], [1], [0, 0, 1, 1], [], []>} : vector<16x32xf32>, vector<32x32xf32>, vector<16x32xf32> -> vector<16x32xf32>
    %160 = arith.addf %86, %159 : vector<16x32xf32>
    %cst_42 = arith.constant dense<0.000000e+00> : vector<16xf32>
    %161 = vector.multi_reduction <add>, %160, %cst_42 [1] : vector<16x32xf32> to vector<16xf32>
    %162 = vector.shape_cast %161 : vector<16xf32> to vector<16x1xf32>
    %cst_43 = arith.constant 3.200000e+01 : f32
    %163 = vector.broadcast %cst_43 : f32 to vector<16x1xf32>
    %164 = arith.divf %162, %163 : vector<16x1xf32>
    %165 = vector.broadcast %164 : vector<16x1xf32> to vector<16x32xf32>
    %166 = arith.subf %160, %165 : vector<16x32xf32>
    %167 = arith.mulf %166, %166 : vector<16x32xf32>
    %cst_44 = arith.constant dense<0.000000e+00> : vector<16xf32>
    %168 = vector.multi_reduction <add>, %167, %cst_44 [1] : vector<16x32xf32> to vector<16xf32>
    %169 = vector.shape_cast %168 : vector<16xf32> to vector<16x1xf32>
    %cst_45 = arith.constant 0.0322580636 : f32
    %170 = vector.broadcast %cst_45 : f32 to vector<16x1xf32>
    %171 = arith.mulf %169, %170 : vector<16x1xf32>
    %172 = vector.broadcast %164 : vector<16x1xf32> to vector<16x32xf32>
    %173 = arith.subf %160, %172 : vector<16x32xf32>
    %174 = math.sqrt %171 : vector<16x1xf32>
    %cst_46 = arith.constant 9.99999997E-7 : f32
    %175 = vector.broadcast %cst_46 : f32 to vector<16x1xf32>
    %176 = arith.addf %174, %175 : vector<16x1xf32>
    %177 = vector.broadcast %176 : vector<16x1xf32> to vector<16x32xf32>
    %178 = arith.divf %173, %177 : vector<16x32xf32>
    %cst_47 = arith.constant dense<0.000000e+00> : vector<16x64xf32>
    %179 = tpu.matmul %178, %9, %cst_47 {dimension_numbers = #tpu.dot_dimension_numbers<[1], [0], [0], [1], [0, 0, 1, 1], [], []>} : vector<16x32xf32>, vector<32x64xf32>, vector<16x64xf32> -> vector<16x64xf32>
    %180 = vector.broadcast %11 : vector<1x64xf32> to vector<16x64xf32>
    %181 = arith.addf %179, %180 : vector<16x64xf32>
    %cst_48 = arith.constant 0.000000e+00 : f32
    %182 = vector.broadcast %cst_48 : f32 to vector<16x64xf32>
    %183 = arith.maximumf %181, %182 : vector<16x64xf32>
    %cst_49 = arith.constant dense<0.000000e+00> : vector<16x32xf32>
    %184 = tpu.matmul %183, %10, %cst_49 {dimension_numbers = #tpu.dot_dimension_numbers<[1], [0], [0], [1], [0, 0, 1, 1], [], []>} : vector<16x64xf32>, vector<64x32xf32>, vector<16x32xf32> -> vector<16x32xf32>
    %185 = vector.broadcast %12 : vector<1x32xf32> to vector<16x32xf32>
    %186 = arith.addf %184, %185 : vector<16x32xf32>
    %187 = arith.addf %160, %186 : vector<16x32xf32>
    %c0_50 = arith.constant 0 : index
    %c0_51 = arith.constant 0 : index
    %188 = vector.load %arg2[%c0_50, %c0_51] : memref<16x32xf32, #tpu.memory_space<vmem>>, vector<16x32xf32>
    tpu.vector_store %arg2[%c0_50, %c0_51], %187 {strides = array<i32>} : memref<16x32xf32, #tpu.memory_space<vmem>>, vector<16x32xf32>,
    return
  }
}

</mosaic_0001>

<bundles_post_ra>
// kernel: decoder_block.1
= control target key start
LH: loop header
LB: loop body
LE: loop exit
PB: predicated region body
PF: predicated region fallthrough
CT: control target
= control target key end

     0   :  { %7 = vsyncpa [#allocation3], 0  ;;  %s3720_s0 = inlined_call_operand.vmem [shape: f32[16,96], index: 0, kind: input, shape index: {}]   ;;  %s3721_s1 = inlined_call_operand.hbm [shape: f32[128,128], index: 1, kind: input, shape index: {}]   ;;  %s3722_s2 = inlined_call_operand.hbm [shape: f32[16,32], index: 2, kind: output, shape index: {}]  }
   0x1   :  { %8 = vsyncpa [#allocation4], 0  ;;  %s3313_s9 = smov [#allocation2]   ;;  %s3265_s13 = scalar_lea.hbm %s3721_s1, 2048 }
   0x2   :  { %s16_s10 = sshll.u32 %s3313_s9, 4  ;;  %p3266_p0 = scmp.ne.s32.totalorder %s3721_s1, %s3265_s13  ;;  %s17_s10 = int_to_ptr.vmem [resolvable:$true] %s16_s10 }
   0x3   :  { %p3269_p1 = scmp.lt.u32.totalorder %s3265_s13, %s3721_s1 }
   0x5   :  { %p3271_p2 = pnand %p3269_p1, %p3266_p0 }
   0x7   :  { %3274 = shalt.err (!%p3271_p2)
}
   0x8   :  { %s3275_s18 = scalar_lea.vmem %s17_s10, 2048  ;;  %p3280_p4 = scmp.lt.s32.totalorder %s17_s10, %s17_s10 }
   0x9   :  { %p3276_p3 = scmp.ne.s32.totalorder %s17_s10, %s3275_s18  ;;  %p3281_p5 = scmp.lt.s32.totalorder %s3275_s18, %s3275_s18 }
   0xb   :  { %p3282_p6 = por %p3281_p5, %p3280_p4 }
   0xd   :  { %p3283_p7 = pnand %p3282_p6, %p3276_p3 }
   0xf   :  { %3286 = shalt.err (!%p3283_p7)
}
  0x10   :  { %s3314_s19 = smov 128   ;;  %s3315_s20 = smov 8  }
  0x11   :  { %22 = dma.hbm_to_vmem [thread:$0]  %s3721_s1, 2048, %s17_s10, [#allocation3], %s3314_s19, %s3314_s19, %s3315_s20  }
  0x12   :  { %3309 = dma.done.wait [#allocation3], 2048  }
  0x13   :  { %3310 = vsyncadd [#allocation3], 4294965248  ;;  %vm50_vm0 = vcmask 261120   ;;  %v3359_v0 = vld [vmem:[%s3720_s0] sm:$0xff]  ;;  %v3364_v1 = vld [vmem:[%s3720_s0 + $0x8] sm:$0xff]  ;;  %vm199_vm5 = vcmask 64512  }
  0x14   :  { %v51_v2 = vsel %vm50_vm0, %v3359_v0, 0.0  ;;  %v54_v3 = vsel %vm50_vm0, %v3364_v1, 0.0  ;;  %v3374_v14 = vld [vmem:[#allocation2] sm:$0xff]  ;;  %v3376_v15 = vld [vmem:[#allocation2 + $0x8] sm:$0xff]  ;;  %v3378_v16 = vld [vmem:[#allocation2 + $0x10] sm:$0xff]  ;;  %s3316_s0 = smov 120  }
  0x15   :  { %52 = vadd.xlane.f32.xlu0 %v51_v2  ;;  %v3092_v17 = vpack.i.bf16 %v3376_v15, %v3374_v14  ;;  %v2895_v18 = vpack.c.bf16 %v3376_v15, %v3374_v14  ;;  %v3384_v19 = vld [vmem:[#allocation2 + $0x18] sm:$0xff]  ;;  %s3317_s1 = smov 112   ;;  %s3318_s27 = smov 104   ;;  %vm3412_vm6 = vmpackc.low %vm199_vm5, %vm199_vm5  ;;  %vm544_vm7 = vcmask 130048   ;;  %vm1009_vm8 = vcmask 195584  }
  0x16   :  { %v2899_v20 = vpack.c.bf16 %v3384_v19, %v3378_v16  ;;  %s3319_s28 = smov 96   ;;  %s3320_s29 = smov 64  }
  0x17   :  { %2896 = vmatprep.subr.bf16.mxu1 %v2895_v18  ;;  %s3321_s30 = smov 32   ;;  %s3322_s3 = smov 16  }
  0x18   :  { %2898 = vmatpush3.bf16.msra.mxu1 %v2895_v18  ;;  %s3323_s4 = smov 24   ;;  %s3324_s5 = smov 48  }
  0x19   :  { %55 = vadd.xlane.f32.xlu0 %v54_v3  ;;  %2900 = vmatprep.subr.bf16.mxu1 %v2899_v20  ;;  %s3325_s6 = smov [#allocation5]  }
  0x1a   :  { %s2512_s7 = sshll.u32 %s3325_s6, 4  ;;  %s2513_s7 = int_to_ptr.vmem [resolvable:$true] %s2512_s7 }
  0x1b   :  { %s3287_s8 = scalar_lea.vmem %s2513_s7, 256  ;;  %p3292_p9 = scmp.lt.s32.totalorder %s2513_s7, %s2513_s7 }
  0x1c   :  { %2902 = vmatpush3.bf16.msra.mxu1 %v2899_v20  ;;  %p3288_p8 = scmp.ne.s32.totalorder %s2513_s7, %s3287_s8  ;;  %p3293_p10 = scmp.lt.s32.totalorder %s3287_s8, %s3287_s8 }
  0x1e   :  { %p3294_p11 = por %p3293_p10, %p3292_p9 }
  0x20   :  { %p3295_p12 = pnand %p3294_p11, %p3288_p8 }
  0xa2   :  { %v53_v4 = vpop.xlane.xlu0 %52 }
  0xa3   :  { %v58_v5 = vmul.f32 0.03125, %v53_v4 }
  0xa5   :  { %v60_v6 = vsub.f32 %v3359_v0, %v58_v5 }
  0xa6   :  { %v56_v7 = vpop.xlane.xlu0 %55 }
  0xa7   :  { %v59_v8 = vmul.f32 0.03125, %v56_v7  ;;  %v62_v9 = vmul.f32 %v60_v6, %v60_v6 }
  0xa9   :  { %v61_v10 = vsub.f32 %v3364_v1, %v59_v8  ;;  %v64_v11 = vsel %vm50_vm0, %v62_v9, 0.0 }
  0xaa   :  { %65 = vadd.xlane.f32.xlu1 %v64_v11 }
  0xab   :  { %v63_v12 = vmul.f32 %v61_v10, %v61_v10 }
  0xad   :  { %v67_v13 = vsel %vm50_vm0, %v63_v12, 0.0 }
  0xae   :  { %68 = vadd.xlane.f32.xlu1 %v67_v13 }
 0x137   :  { %v66_v21 = vpop.xlane.xlu1 %65 }
 0x138   :  { %v70_v22 = vmul.f32 0.032258064, %v66_v21 }
 0x13a   :  { %3177 = vrsqrt.f32 %v70_v22  ;;  %vm74_vm1 = vcmp.eq.f32.partialorder %v70_v22, inf  ;;  %v77_v27 = vand.u32 2147483648, %v70_v22  ;;  %vm76_vm2 = vcmp.eq.f32.partialorder %v70_v22, 0.0 }
 0x13b   :  { %v69_v23 = vpop.xlane.xlu1 %68 }
 0x13c   :  { %v71_v24 = vmul.f32 0.032258064, %v69_v23 }
 0x13e   :  { %3179 = vrsqrt.f32 %v71_v24  ;;  %vm81_vm3 = vcmp.eq.f32.partialorder %v71_v24, inf  ;;  %v84_v33 = vand.u32 2147483648, %v71_v24  ;;  %vm83_vm4 = vcmp.eq.f32.partialorder %v71_v24, 0.0 }
 0x144   :  { %v3178_v25 = vpop.eup %3177 }
 0x145   :  { %v73_v26 = vmul.f32 %v3178_v25, %v70_v22 }
 0x147   :  { %v75_v28 = vsel %vm74_vm1, %v70_v22, %v73_v26 }
 0x148   :  { %v3180_v29 = vpop.eup %3179  ;;  %v78_v30 = vsel %vm76_vm2, %v77_v27, %v75_v28  ;;  %vm2421_vm2 = vcmask 523264  }
 0x149   :  { %v80_v31 = vmul.f32 %v3180_v29, %v71_v24  ;;  %v86_v32 = vadd.f32 1e-06, %v78_v30 }
 0x14b   :  { %v82_v34 = vsel %vm81_vm3, %v71_v24, %v80_v31  ;;  %3181 = vrcp.f32 %v86_v32 }
 0x14c   :  { %v85_v35 = vsel %vm83_vm4, %v84_v33, %v82_v34 }
 0x14d   :  { %v87_v36 = vadd.f32 1e-06, %v85_v35 }
 0x14f   :  { %3183 = vrcp.f32 %v87_v36 }
 0x155   :  { %v3182_v37 = vpop.eup %3181 }
 0x156   :  { %v89_v38 = vmul.f32 %v3182_v37, %v60_v6 }
 0x158   :  { %2706 = vmatprep.mubr.msk.f32.mxu1 %vm50_vm0, %v89_v38 }
 0x159   :  { %v3184_v39 = vpop.eup %3183 }
 0x15a   :  { %v91_v40 = vmul.f32 %v3184_v39, %v61_v10 }
 0x15c   :  { %2707 = vmatmul.mubr.msk.f32.vlgmr.msra.gmra.mrb[0].mxu1 %vm50_vm0, %v91_v40 }
 0x22f   :  { %v2708_v41 = vpop.f32.mrb[0].mxu1 }
 0x230   :  { %177 = vrot.lane.b32.xlu1 %v2708_v41, %s3316_s0  ;;  %v164_v42 = vpop.f32.mrb[1].mxu1 }
 0x231   :  { %175 = vrot.lane.b32.xlu0 %v164_v42, %s3316_s0  ;;  %2713 = vmatprep.mubr.msk.f32.mxu1 %vm199_vm5, %v164_v42  ;;  %v3393_v43 = vpack.i.bf16 %v2708_v41, %v164_v42 }
 0x234   :  { %181 = vrot.lane.b32.xlu1 %v2708_v41, %s3317_s1 }
 0x235   :  { %183 = vrot.lane.b32.xlu0 %v164_v42, %s3318_s27 }
 0x238   :  { %179 = vrot.lane.b32.xlu1 %v164_v42, %s3317_s1 }
 0x239   :  { %3053 = vrot.lane.b32.xlu0 %v3393_v43, %s3319_s28 }
 0x23c   :  { %185 = vrot.lane.b32.xlu1 %v2708_v41, %s3318_s27 }
 0x2a2   :  { %v178_v44 = vpop.permute.xlu1 %177 }
 0x2a3   :  { %v176_v45 = vpop.permute.xlu0 %175 }
 0x2a4   :  { %v3401_v46 = vpack.i.bf16 %v178_v44, %v176_v45  ;;  %2720 = vmatprep.mubr.msk.f32.mxu0 %vm199_vm5, %v176_v45 }
 0x2a6   :  { %v182_v47 = vpop.permute.xlu1 %181  ;;  %3058 = vrot.lane.b32.xlu1 %v3401_v46, %s3319_s28 }
 0x2a7   :  { %v184_v48 = vpop.permute.xlu0 %183 }
 0x2aa   :  { %v180_v49 = vpop.permute.xlu1 %179 }
 0x2ab   :  { %v3406_v50 = vpack.i.bf16 %v182_v47, %v180_v49  ;;  %v3054_v51 = vpop.permute.xlu0 %3053 }
 0x2ac   :  { %v3056_v52 = vunpack.i.h.bf16 %v3054_v51  ;;  %v3055_v53 = vunpack.i.l.bf16 %v3054_v51 }
 0x2ad   :  { %3063 = vrot.lane.b32.xlu0 %v3406_v50, %s3319_s28 }
 0x2ae   :  { %v2903_v55 = vpack.c.bf16 %v3056_v52, %v3055_v53  ;;  %v186_v56 = vpop.permute.xlu1 %185 }
 0x2af   :  { %v3416_v57 = vpack.i.bf16 %v186_v56, %v184_v48 }
 0x2b0   :  { %2905 = vmatprep.subr.msk.bf16.mxu1 %vm3412_vm6, %v2903_v55 }
 0x2b1   :  { %3068 = vrot.lane.b32.xlu1 %v3416_v57, %s3319_s28  ;;  %2908 = vmatpush3.bf16.xpose.msk.msra.mxu1 %vm3412_vm6, %v2903_v55 }
 0x2b2   :  { %193 = vrot.lane.b32.xlu0 %v3359_v0, %s3320_s29 }
 0x2b5   :  { %195 = vrot.lane.b32.xlu1 %v3364_v1, %s3320_s29 }
 0x2b8   :  { %2714 = vmatmul.mubr.msk.f32.vlgmr.msra.gmra.mrb[2].mxu1 %vm199_vm5, %v2708_v41 }
 0x2b9   :  { %2727 = vmatprep.mubr.msk.f32.mxu1 %vm199_vm5, %v180_v49 }
 0x318   :  { %v3059_v58 = vpop.permute.xlu1 %3058 }
 0x319   :  { %v3061_v59 = vunpack.i.h.bf16 %v3059_v58  ;;  %v3060_v60 = vunpack.i.l.bf16 %v3059_v58 }
 0x31b   :  { %v2909_v61 = vpack.c.bf16 %v3061_v59, %v3060_v60 }
 0x31d   :  { %2911 = vmatprep.subr.msk.bf16.mxu0 %vm3412_vm6, %v2909_v61 }
 0x31e   :  { %2914 = vmatpush3.bf16.xpose.msk.msra.mxu0 %vm3412_vm6, %v2909_v61 }
 0x31f   :  { %v3064_v62 = vpop.permute.xlu0 %3063 }
 0x320   :  { %v3066_v63 = vunpack.i.h.bf16 %v3064_v62  ;;  %v3065_v2 = vunpack.i.l.bf16 %v3064_v62 }
 0x322   :  { %v2915_v3 = vpack.c.bf16 %v3066_v63, %v3065_v2 }
 0x323   :  { %v3069_v4 = vpop.permute.xlu1 %3068 }
 0x324   :  { %v3071_v5 = vunpack.i.h.bf16 %v3069_v4  ;;  %v3070_v6 = vunpack.i.l.bf16 %v3069_v4  ;;  %2917 = vmatprep.subr.msk.bf16.mxu1 %vm3412_vm6, %v2915_v3  ;;  %v194_v9 = vpop.permute.xlu0 %193 }
 0x325   :  { %2721 = vmatmul.mubr.msk.f32.vlgmr.msra.gmra.mrb[0].mxu0 %vm199_vm5, %v178_v44  ;;  %2920 = vmatpush3.bf16.xpose.msk.msra.mxu1 %vm3412_vm6, %v2915_v3 }
 0x326   :  { %v2921_v7 = vpack.c.bf16 %v3071_v5, %v3070_v6  ;;  %2734 = vmatprep.mubr.msk.f32.mxu0 %vm199_vm5, %v184_v48 }
 0x327   :  { %v196_v8 = vpop.permute.xlu1 %195 }
 0x328   :  { %2923 = vmatprep.subr.msk.bf16.mxu0 %vm3412_vm6, %v2921_v7 }
 0x329   :  { %2926 = vmatpush3.bf16.xpose.msk.msra.mxu0 %vm3412_vm6, %v2921_v7 }
 0x32c   :  { %2728 = vmatmul.mubr.msk.f32.vlgmr.msra.gmra.mrb[4].mxu1 %vm199_vm5, %v182_v47 }
 0x330   :  { %2735 = vmatmul.mubr.msk.f32.vlgmr.msra.gmra.mrb[2].mxu0 %vm199_vm5, %v186_v56 }
 0x38b   :  { %v2715_v10 = vpop.f32.mrb[2].mxu1 }
 0x38c   :  { %v280_v11 = vadd.f32 %v2715_v10, %v196_v8  ;;  %v274_v12 = vpop.f32.mrb[3].mxu1 }
 0x38d   :  { %v275_v13 = vadd.f32 %v274_v12, %v194_v9 }
 0x38e   :  { %v548_v18 = vsel %vm544_vm7, %v280_v11, -inf }
 0x38f   :  { %549 = vmax.xlane.f32.xlu1 %v548_v18  ;;  %v545_v20 = vsel %vm544_vm7, %v275_v13, -inf }
 0x390   :  { %546 = vmax.xlane.f32.xlu0 %v545_v20 }
 0x3f8   :  { %v2722_v21 = vpop.f32.mrb[0].mxu0 }
 0x3f9   :  { %v367_v22 = vadd.f32 %v2722_v21, %v196_v8  ;;  %v361_v23 = vpop.f32.mrb[1].mxu0 }
 0x3fa   :  { %v362_v24 = vadd.f32 %v361_v23, %v194_v9 }
 0x3fb   :  { %v554_v25 = vsel %vm544_vm7, %v367_v22, -inf }
 0x3fc   :  { %555 = vmax.xlane.f32.xlu0 %v554_v25  ;;  %v551_v27 = vsel %vm544_vm7, %v362_v24, -inf }
 0x3ff   :  { %v2729_v26 = vpop.f32.mrb[4].mxu1 }
 0x400   :  { %v454_v28 = vadd.f32 %v2729_v26, %v196_v8  ;;  %v448_v29 = vpop.f32.mrb[5].mxu1  ;;  %552 = vmax.xlane.f32.xlu0 %v551_v27 }
 0x401   :  { %v449_v30 = vadd.f32 %v448_v29, %v194_v9 }
 0x402   :  { %v560_v31 = vsel %vm544_vm7, %v454_v28, -inf }
 0x403   :  { %v2736_v32 = vpop.f32.mrb[2].mxu0  ;;  %561 = vmax.xlane.f32.xlu1 %v560_v31  ;;  %v557_v33 = vsel %vm544_vm7, %v449_v30, -inf }
 0x404   :  { %v541_v34 = vadd.f32 %v2736_v32, %v196_v8  ;;  %v535_v35 = vpop.f32.mrb[3].mxu0  ;;  %558 = vmax.xlane.f32.xlu0 %v557_v33 }
 0x405   :  { %v536_v36 = vadd.f32 %v535_v35, %v194_v9 }
 0x406   :  { %v566_v37 = vsel %vm544_vm7, %v541_v34, -inf }
 0x407   :  { %567 = vmax.xlane.f32.xlu1 %v566_v37  ;;  %v563_v38 = vsel %vm544_vm7, %v536_v36, -inf }
 0x408   :  { %564 = vmax.xlane.f32.xlu0 %v563_v38 }
 0x41c   :  { %v550_v39 = vpop.xlane.xlu1 %549 }
 0x41d   :  { %v570_v40 = vsub.f32 %v280_v11, %v550_v39  ;;  %v547_v41 = vpop.xlane.xlu0 %546 }
 0x41e   :  { %v569_v42 = vsub.f32 %v275_v13, %v547_v41 }
 0x41f   :  { %v579_v44 = vmul.f32 1.442695, %v570_v40 }
 0x420   :  { %v577_v45 = vmul.f32 1.442695, %v569_v42 }
 0x421   :  { %3185 = vpow2.f32 %v579_v44 }
 0x422   :  { %3187 = vpow2.f32 %v577_v45 }
 0x42b   :  { %v3454_v47 = vpop.eup %3185 }
 0x42c   :  { %v3188_v48 = vpop.eup %3187  ;;  %v596_v49 = vsel %vm544_vm7, %v3454_v47, 0.0 }
 0x42d   :  { %597 = vadd.xlane.f32.xlu1 %v596_v49  ;;  %v593_v51 = vsel %vm544_vm7, %v3188_v48, 0.0 }
 0x42e   :  { %594 = vadd.xlane.f32.xlu0 %v593_v51 }
 0x489   :  { %v556_v52 = vpop.xlane.xlu0 %555 }
 0x48a   :  { %v572_v53 = vsub.f32 %v367_v22, %v556_v52 }
 0x48c   :  { %v583_v55 = vmul.f32 1.442695, %v572_v53 }
 0x48d   :  { %v553_v56 = vpop.xlane.xlu0 %552 }
 0x48e   :  { %3189 = vpow2.f32 %v583_v55  ;;  %v571_v58 = vsub.f32 %v362_v24, %v553_v56 }
 0x490   :  { %v581_v59 = vmul.f32 1.442695, %v571_v58  ;;  %v562_v60 = vpop.xlane.xlu1 %561 }
 0x491   :  { %v574_v61 = vsub.f32 %v454_v28, %v562_v60  ;;  %v559_v62 = vpop.xlane.xlu0 %558 }
 0x492   :  { %3191 = vpow2.f32 %v581_v59  ;;  %v573_v63 = vsub.f32 %v449_v30, %v559_v62 }
 0x493   :  { %v587_v2 = vmul.f32 1.442695, %v574_v61 }
 0x494   :  { %v585_v3 = vmul.f32 1.442695, %v573_v63  ;;  %v568_v4 = vpop.xlane.xlu1 %567 }
 0x495   :  { %3193 = vpow2.f32 %v587_v2  ;;  %v576_v5 = vsub.f32 %v541_v34, %v568_v4  ;;  %v565_v6 = vpop.xlane.xlu0 %564 }
 0x496   :  { %3195 = vpow2.f32 %v585_v3  ;;  %v575_v7 = vsub.f32 %v536_v36, %v565_v6  ;;  %v3097_v3 = vpack.i.bf16 %v3384_v19, %v3378_v16 }
 0x497   :  { %v591_v8 = vmul.f32 1.442695, %v576_v5 }
 0x498   :  { %v3459_v9 = vpop.eup %3189  ;;  %v589_v10 = vmul.f32 1.442695, %v575_v7 }
 0x499   :  { %3197 = vpow2.f32 %v591_v8  ;;  %v602_v11 = vsel %vm544_vm7, %v3459_v9, 0.0 }
 0x49a   :  { %3199 = vpow2.f32 %v589_v10  ;;  %603 = vadd.xlane.f32.xlu1 %v602_v11 }
 0x49c   :  { %v3463_v12 = vpop.eup %3191 }
 0x49d   :  { %v599_v13 = vsel %vm544_vm7, %v3463_v12, 0.0 }
 0x49e   :  { %600 = vadd.xlane.f32.xlu0 %v599_v13 }
 0x49f   :  { %v3467_v18 = vpop.eup %3193 }
 0x4a0   :  { %v3196_v20 = vpop.eup %3195  ;;  %v608_v21 = vsel %vm544_vm7, %v3467_v18, 0.0 }
 0x4a1   :  { %609 = vadd.xlane.f32.xlu1 %v608_v21  ;;  %v605_v22 = vsel %vm544_vm7, %v3196_v20, 0.0 }
 0x4a2   :  { %606 = vadd.xlane.f32.xlu0 %v605_v22 }
 0x4a3   :  { %v3472_v23 = vpop.eup %3197 }
 0x4a4   :  { %v3474_v24 = vpop.eup %3199  ;;  %v614_v25 = vsel %vm544_vm7, %v3472_v23, 0.0 }
 0x4a5   :  { %615 = vadd.xlane.f32.xlu1 %v614_v25  ;;  %v611_v26 = vsel %vm544_vm7, %v3474_v24, 0.0 }
 0x4a6   :  { %612 = vadd.xlane.f32.xlu0 %v611_v26 }
 0x4b6   :  { %3078 = vrot.lane.b32.xlu1 %v3401_v46, %s3320_s29 }
 0x4ba   :  { %3083 = vrot.lane.b32.xlu1 %v3406_v50, %s3320_s29  ;;  %v598_v46 = vpop.xlane.xlu1 %597 }
 0x4bb   :  { %v595_v27 = vpop.xlane.xlu0 %594 }
 0x4bc   :  { %3201 = vrcp.f32 %v595_v27  ;;  %3073 = vrot.lane.b32.xlu0 %v3393_v43, %s3320_s29 }
 0x4be   :  { %3088 = vrot.lane.b32.xlu1 %v3416_v57, %s3320_s29 }
 0x4c0   :  { %3093 = vrot.lane.b32.xlu0 %v3092_v17, %s3321_s30 }
 0x4c2   :  { %3098 = vrot.lane.b32.xlu1 %v3097_v3, %s3321_s30 }
 0x4c6   :  { %v3202_v28 = vpop.eup %3201 }
 0x4c7   :  { %v618_v29 = vmul.f32 %v3202_v28, %v3188_v48 }
 0x4c9   :  { %2741 = vmatprep.mubr.msk.f32.mxu1 %vm544_vm7, %v618_v29 }
 0x527   :  { %v604_v50 = vpop.xlane.xlu1 %603 }
 0x52b   :  { %v601_v30 = vpop.xlane.xlu0 %600 }
 0x52e   :  { %v610_v31 = vpop.xlane.xlu1 %609 }
 0x52f   :  { %v607_v32 = vpop.xlane.xlu0 %606 }
 0x530   :  { %3203 = vrcp.f32 %v607_v32 }
 0x531   :  { %3205 = vrcp.f32 %v598_v46 }
 0x532   :  { %3207 = vrcp.f32 %v601_v30  ;;  %v616_v43 = vpop.xlane.xlu1 %615 }
 0x533   :  { %v613_v57 = vpop.xlane.xlu0 %612  ;;  %3209 = vrcp.f32 %v610_v31 }
 0x534   :  { %3211 = vrcp.f32 %v604_v50 }
 0x535   :  { %3213 = vrcp.f32 %v613_v57 }
 0x536   :  { %v3079_v33 = vpop.permute.xlu1 %3078  ;;  %3215 = vrcp.f32 %v616_v43 }
 0x537   :  { %v3074_v34 = vpop.permute.xlu0 %3073  ;;  %v3081_v35 = vunpack.i.h.bf16 %v3079_v33  ;;  %v3080_v36 = vunpack.i.l.bf16 %v3079_v33 }
 0x538   :  { %v3076_v37 = vunpack.i.h.bf16 %v3074_v34  ;;  %v3075_v14 = vunpack.i.l.bf16 %v3074_v34 }
 0x539   :  { %v2931_v45 = vpack.c.bf16 %v3081_v35, %v3080_v36 }
 0x53a   :  { %v3204_v15 = vpop.eup %3203  ;;  %v2927_v17 = vpack.c.bf16 %v3076_v37, %v3075_v14  ;;  %v3084_v38 = vpop.permute.xlu1 %3083  ;;  %v34_v37 = vld [vmem:[#allocation2 + $0x30] sm:$0xff]  ;;  %v35_v14 = vld [vmem:[#allocation2 + $0x38] sm:$0xff] }
 0x53b   :  { %v3206_v39 = vpop.eup %3205  ;;  %v3086_v40 = vunpack.i.h.bf16 %v3084_v38  ;;  %v3085_v41 = vunpack.i.l.bf16 %v3084_v38  ;;  %v626_v42 = vmul.f32 %v3204_v15, %v3196_v20  ;;  %v3094_v4 = vpop.permute.xlu0 %3093  ;;  %v3533_v15 = vpack.i.bf16 %v35_v14, %v34_v37 }
 0x53c   :  { %v3208_v44 = vpop.eup %3207  ;;  %2928 = vmatprep.subr.bf16.mxu1 %v2927_v17  ;;  %v620_v51 = vmul.f32 %v3206_v39, %v3454_v47  ;;  %v3096_v5 = vunpack.i.h.bf16 %v3094_v4  ;;  %v3095_v6 = vunpack.i.l.bf16 %v3094_v4 }
 0x53d   :  { %v2935_v48 = vpack.c.bf16 %v3086_v40, %v3085_v41  ;;  %2930 = vmatpush3.bf16.msra.mxu1 %v2927_v17  ;;  %2755 = vmatprep.mubr.msk.f32.mxu0 %vm544_vm7, %v626_v42  ;;  %v3210_v49 = vpop.eup %3209  ;;  %v622_v58 = vmul.f32 %v3208_v44, %v3463_v12 }
 0x53e   :  { %v3089_v52 = vpop.permute.xlu1 %3088  ;;  %2932 = vmatprep.subr.bf16.mxu1 %v2931_v45  ;;  %v3212_v53 = vpop.eup %3211  ;;  %v628_v60 = vmul.f32 %v3210_v49, %v3467_v18  ;;  %v2943_v7 = vpack.c.bf16 %v3096_v5, %v3095_v6 }
 0x53f   :  { %v3091_v55 = vunpack.i.h.bf16 %v3089_v52  ;;  %v3090_v56 = vunpack.i.l.bf16 %v3089_v52  ;;  %2936 = vmatprep.subr.bf16.mxu0 %v2935_v48  ;;  %v3214_v59 = vpop.eup %3213  ;;  %v624_v47 = vmul.f32 %v3212_v53, %v3459_v9  ;;  %v33_v52 = vld [vmem:[#allocation2 + $0x28] sm:$0xff] }
 0x540   :  { %2742 = vmatmul.mubr.msk.f32.vlgmr.msra.gmra.mrb[6].mxu1 %vm544_vm7, %v620_v51  ;;  %2938 = vmatpush3.bf16.msra.mxu0 %v2935_v48  ;;  %v3216_v62 = vpop.eup %3215  ;;  %v630_v63 = vmul.f32 %v3214_v59, %v3474_v24  ;;  %v32_v51 = vld [vmem:[#allocation2 + $0x20] sm:$0xff]  ;;  %v2955_v59 = vpack.c.bf16 %v35_v14, %v34_v37 }
 0x541   :  { %v2939_v61 = vpack.c.bf16 %v3091_v55, %v3090_v56  ;;  %2934 = vmatpush3.bf16.msra.mxu1 %v2931_v45  ;;  %2748 = vmatprep.mubr.msk.f32.mxu1 %vm544_vm7, %v622_v58  ;;  %v632_v2 = vmul.f32 %v3216_v62, %v3472_v23  ;;  %v3545_v53 = vpack.i.bf16 %v33_v52, %v32_v51 }
 0x542   :  { %2944 = vmatprep.subr.bf16.mxu0 %v2943_v7  ;;  %v3099_v8 = vpop.permute.xlu1 %3098  ;;  %v2951_v58 = vpack.c.bf16 %v33_v52, %v32_v51 }
 0x543   :  { %2756 = vmatmul.mubr.msk.f32.vlgmr.msra.gmra.mrb[4].mxu0 %vm544_vm7, %v628_v60  ;;  %2940 = vmatprep.subr.bf16.mxu1 %v2939_v61  ;;  %v3101_v9 = vunpack.i.h.bf16 %v3099_v8  ;;  %v3100_v10 = vunpack.i.l.bf16 %v3099_v8 }
 0x544   :  { %2749 = vmatmul.mubr.msk.f32.vlgmr.msra.gmra.mrb[8].mxu1 %vm544_vm7, %v624_v47  ;;  %2946 = vmatpush3.bf16.msra.mxu0 %v2943_v7 }
 0x545   :  { %2942 = vmatpush3.bf16.msra.mxu1 %v2939_v61  ;;  %2762 = vmatprep.mubr.msk.f32.mxu1 %vm544_vm7, %v630_v63  ;;  %v2947_v11 = vpack.c.bf16 %v3101_v9, %v3100_v10 }
 0x546   :  { %2952 = vmatprep.subr.bf16.mxu1 %v2951_v58 }
 0x547   :  { %2948 = vmatprep.subr.bf16.mxu0 %v2947_v11 }
 0x548   :  { %2763 = vmatmul.mubr.msk.f32.vlgmr.msra.gmra.mrb[10].mxu1 %vm544_vm7, %v632_v2  ;;  %2950 = vmatpush3.bf16.msra.mxu0 %v2947_v11 }
 0x549   :  { %2954 = vmatpush3.bf16.msra.mxu1 %v2951_v58 }
 0x54a   :  { %2956 = vmatprep.subr.bf16.mxu1 %v2955_v59 }
 0x54d   :  { %2958 = vmatpush3.bf16.msra.mxu1 %v2955_v59 }
 0x613   :  { %v2743_v12 = vpop.f32.mrb[6].mxu1 }
 0x614   :  { %v711_v13 = vpop.f32.mrb[7].mxu1 }
 0x616   :  { %v2757_v18 = vpop.f32.mrb[4].mxu0 }
 0x617   :  { %v2750_v20 = vpop.f32.mrb[8].mxu1  ;;  %v885_v21 = vpop.f32.mrb[5].mxu0 }
 0x618   :  { %985 = vrot.lane.b32.xlu1 %v2750_v20, %s3315_s20  ;;  %v798_v16 = vpop.f32.mrb[9].mxu1 }
 0x619   :  { %983 = vrot.lane.b32.xlu0 %v798_v16, %s3315_s20 }
 0x61b   :  { %v2764_v19 = vpop.f32.mrb[10].mxu1 }
 0x61c   :  { %993 = vrot.lane.b32.xlu1 %v2757_v18, %s3322_s3  ;;  %v972_v22 = vpop.f32.mrb[11].mxu1 }
 0x61d   :  { %991 = vrot.lane.b32.xlu0 %v885_v21, %s3322_s3 }
 0x620   :  { %1001 = vrot.lane.b32.xlu1 %v2764_v19, %s3323_s4 }
 0x621   :  { %999 = vrot.lane.b32.xlu0 %v972_v22, %s3323_s4 }
 0x68a   :  { %v986_v23 = vpop.permute.xlu1 %985 }
 0x68b   :  { %v984_v24 = vpop.permute.xlu0 %983  ;;  %v1006_v29 = vsel %vm199_vm5, %v2743_v12, %v986_v23 }
 0x68c   :  { %v1005_v27 = vsel %vm199_vm5, %v711_v13, %v984_v24 }
 0x68e   :  { %v994_v25 = vpop.permute.xlu1 %993 }
 0x68f   :  { %v992_v26 = vpop.permute.xlu0 %991  ;;  %v1008_v30 = vsel %vm544_vm7, %v1006_v29, %v994_v25 }
 0x690   :  { %v1007_v46 = vsel %vm544_vm7, %v1005_v27, %v992_v26 }
 0x692   :  { %v1002_v28 = vpop.permute.xlu1 %1001 }
 0x693   :  { %v1000_v50 = vpop.permute.xlu0 %999  ;;  %v1011_v32 = vsel %vm1009_vm8, %v1008_v30, %v1002_v28 }
 0x694   :  { %v1010_v31 = vsel %vm1009_vm8, %v1007_v46, %v1000_v50 }
 0x695   :  { %2773 = vmatprep.mubr.msk.f32.mxu0 %vm50_vm0, %v1010_v31 }
 0x696   :  { %2774 = vmatmul.mubr.msk.f32.vlgmr.msra.gmra.mrb[6].mxu0 %vm50_vm0, %v1011_v32 }
 0x769   :  { %v2775_v43 = vpop.f32.mrb[6].mxu0 }
 0x76a   :  { %v3524_v57 = vadd.f32 %v2775_v43, %v3364_v1  ;;  %v1100_v33 = vpop.f32.mrb[7].mxu0 }
 0x76b   :  { %v3527_v34 = vadd.f32 %v1100_v33, %v3359_v0 }
 0x76c   :  { %v1114_v35 = vsel %vm50_vm0, %v3524_v57, 0.0 }
 0x76d   :  { %1115 = vadd.xlane.f32.xlu1 %v1114_v35  ;;  %v1111_v36 = vsel %vm50_vm0, %v3527_v34, 0.0 }
 0x76e   :  { %1112 = vadd.xlane.f32.xlu0 %v1111_v36 }
 0x77e   :  { %3108 = vrot.lane.b32.xlu1 %v3533_v15, %s3319_s28 }
 0x782   :  { %1232 = vrot.lane.b32.xlu1 %v3359_v0, %s3319_s28 }
 0x786   :  { %1234 = vrot.lane.b32.xlu1 %v3364_v1, %s3319_s28 }
 0x7fa   :  { %v1116_v17 = vpop.xlane.xlu1 %1115 }
 0x7fb   :  { %v1118_v38 = vmul.f32 0.03125, %v1116_v17  ;;  %v1113_v39 = vpop.xlane.xlu0 %1112 }
 0x7fc   :  { %v1117_v40 = vmul.f32 0.03125, %v1113_v39 }
 0x7fd   :  { %v1120_v41 = vsub.f32 %v3524_v57, %v1118_v38 }
 0x7fe   :  { %v1119_v42 = vsub.f32 %v3527_v34, %v1117_v40  ;;  %v3109_v55 = vpop.permute.xlu1 %3108 }
 0x7ff   :  { %v1122_v44 = vmul.f32 %v1120_v41, %v1120_v41  ;;  %v3111_v63 = vunpack.i.h.bf16 %v3109_v55  ;;  %v3110_v2 = vunpack.i.l.bf16 %v3109_v55 }
 0x800   :  { %v1121_v48 = vmul.f32 %v1119_v42, %v1119_v42 }
 0x801   :  { %v1126_v45 = vsel %vm50_vm0, %v1122_v44, 0.0  ;;  %v2963_v7 = vpack.c.bf16 %v3111_v63, %v3110_v2 }
 0x802   :  { %1127 = vadd.xlane.f32.xlu0 %v1126_v45  ;;  %v1123_v49 = vsel %vm50_vm0, %v1121_v48, 0.0  ;;  %v1233_v56 = vpop.permute.xlu1 %1232 }
 0x803   :  { %2795 = vmatprep.mubr.msk.f32.mxu0 %vm50_vm0, %v1233_v56 }
 0x806   :  { %1124 = vadd.xlane.f32.xlu0 %v1123_v49  ;;  %v1235_v20 = vpop.permute.xlu1 %1234 }
 0x81c   :  { %3103 = vrot.lane.b32.xlu0 %v3545_v53, %s3319_s28 }
 0x88f   :  { %v1128_v60 = vpop.xlane.xlu0 %1127 }
 0x890   :  { %v1130_v61 = vmul.f32 0.032258064, %v1128_v60 }
 0x892   :  { %3217 = vrsqrt.f32 %v1130_v61  ;;  %vm1140_vm9 = vcmp.eq.f32.partialorder %v1130_v61, inf  ;;  %v1143_v10 = vand.u32 2147483648, %v1130_v61  ;;  %vm1142_vm10 = vcmp.eq.f32.partialorder %v1130_v61, 0.0 }
 0x893   :  { %v1125_v47 = vpop.xlane.xlu0 %1124 }
 0x894   :  { %v1129_v62 = vmul.f32 0.032258064, %v1125_v47 }
 0x896   :  { %3219 = vrsqrt.f32 %v1129_v62  ;;  %vm1133_vm11 = vcmp.eq.f32.partialorder %v1129_v62, inf  ;;  %v1136_v16 = vand.u32 2147483648, %v1129_v62  ;;  %vm1135_vm12 = vcmp.eq.f32.partialorder %v1129_v62, 0.0 }
 0x897   :  { %v3104_v3 = vpop.permute.xlu0 %3103 }
 0x898   :  { %v3106_v4 = vunpack.i.h.bf16 %v3104_v3  ;;  %v3105_v5 = vunpack.i.l.bf16 %v3104_v3 }
 0x89a   :  { %v2959_v6 = vpack.c.bf16 %v3106_v4, %v3105_v5 }
 0x89c   :  { %v3218_v8 = vpop.eup %3217  ;;  %2960 = vmatprep.subr.bf16.mxu0 %v2959_v6 }
 0x89d   :  { %v1139_v9 = vmul.f32 %v3218_v8, %v1130_v61  ;;  %2962 = vmatpush3.bf16.msra.mxu0 %v2959_v6 }
 0x89e   :  { %2964 = vmatprep.subr.bf16.mxu0 %v2963_v7 }
 0x89f   :  { %v1141_v11 = vsel %vm1140_vm9, %v1130_v61, %v1139_v9 }
 0x8a0   :  { %v3220_v12 = vpop.eup %3219  ;;  %v1144_v13 = vsel %vm1142_vm10, %v1143_v10, %v1141_v11 }
 0x8a1   :  { %v1132_v18 = vmul.f32 %v3220_v12, %v1129_v62  ;;  %2966 = vmatpush3.bf16.msra.mxu0 %v2963_v7  ;;  %v1146_v21 = vadd.f32 1e-06, %v1144_v13 }
 0x8a3   :  { %v1134_v19 = vsel %vm1133_vm11, %v1129_v62, %v1132_v18  ;;  %3221 = vrcp.f32 %v1146_v21 }
 0x8a4   :  { %2796 = vmatmul.mubr.msk.f32.vlgmr.msra.gmra.mrb[8].mxu0 %vm50_vm0, %v1235_v20  ;;  %v1137_v22 = vsel %vm1135_vm12, %v1136_v16, %v1134_v19 }
 0x8a5   :  { %v1145_v23 = vadd.f32 1e-06, %v1137_v22 }
 0x8a7   :  { %3223 = vrcp.f32 %v1145_v23 }
 0x8ad   :  { %v3222_v24 = vpop.eup %3221 }
 0x8ae   :  { %v1150_v27 = vmul.f32 %v3222_v24, %v1120_v41 }
 0x8b1   :  { %v3224_v25 = vpop.eup %3223 }
 0x8b2   :  { %v1148_v26 = vmul.f32 %v3224_v25, %v1119_v42 }
 0x8b4   :  { %2784 = vmatprep.mubr.msk.f32.mxu1 %vm50_vm0, %v1148_v26 }
 0x8b5   :  { %2785 = vmatmul.mubr.msk.f32.vlgmr.msra.gmra.mrb[12].mxu1 %vm50_vm0, %v1150_v27 }
 0x977   :  { %v2797_v28 = vpop.f32.mrb[8].mxu0 }
 0x978   :  { %v1322_v29 = vpop.f32.mrb[9].mxu0 }
 0x979   :  { %v3553_v46 = vpack.i.bf16 %v2797_v28, %v1322_v29  ;;  %v2967_v50 = vpack.c.bf16 %v2797_v28, %v1322_v29 }
 0x97b   :  { %3113 = vrot.lane.b32.xlu0 %v3553_v46, %s3316_s0  ;;  %3118 = vrot.lane.b32.xlu1 %v3553_v46, %s3317_s1 }
 0x97c   :  { %2969 = vmatprep.subr.msk.bf16.mxu1 %vm3412_vm6, %v2967_v50 }
 0x97d   :  { %2972 = vmatpush3.bf16.xpose.msk.msra.mxu1 %vm3412_vm6, %v2967_v50 }
 0x97f   :  { %3123 = vrot.lane.b32.xlu0 %v3553_v46, %s3318_s27 }
 0x988   :  { %v2786_v30 = vpop.f32.mrb[12].mxu1 }
 0x989   :  { %v1223_v31 = vpop.f32.mrb[13].mxu1  ;;  %1335 = vrot.lane.b32.xlu0 %v2786_v30, %s3316_s0 }
 0x98a   :  { %2802 = vmatprep.mubr.msk.f32.mxu1 %vm199_vm5, %v1223_v31  ;;  %1333 = vrot.lane.b32.xlu1 %v1223_v31, %s3316_s0 }
 0x98b   :  { %2803 = vmatmul.mubr.msk.f32.vlgmr.msra.gmra.mrb[14].mxu1 %vm199_vm5, %v2786_v30 }
 0x98d   :  { %1339 = vrot.lane.b32.xlu0 %v2786_v30, %s3317_s1 }
 0x98e   :  { %1337 = vrot.lane.b32.xlu1 %v1223_v31, %s3317_s1 }
 0x991   :  { %1343 = vrot.lane.b32.xlu0 %v2786_v30, %s3318_s27 }
 0x992   :  { %1341 = vrot.lane.b32.xlu1 %v1223_v31, %s3318_s27 }
 0x995   :  { %1361 = vrot.lane.b32.xlu0 %v3364_v1, %s3324_s5 }
 0x996   :  { %1359 = vrot.lane.b32.xlu1 %v3359_v0, %s3324_s5 }
 0x9ed   :  { %v3575_v32 = vpop.permute.xlu0 %3113  ;;  %v3577_v43 = vpop.permute.xlu1 %3118 }
 0x9ee   :  { %v3116_v33 = vunpack.i.h.bf16 %v3575_v32  ;;  %v3115_v35 = vunpack.i.l.bf16 %v3575_v32  ;;  %v3121_v36 = vunpack.i.h.bf16 %v3577_v43  ;;  %v3120_v37 = vunpack.i.l.bf16 %v3577_v43 }
 0x9f0   :  { %v2973_v14 = vpack.c.bf16 %v3116_v33, %v3115_v35  ;;  %v2979_v17 = vpack.c.bf16 %v3121_v36, %v3120_v37 }
 0x9f1   :  { %v3583_v38 = vpop.permute.xlu0 %3123 }
 0x9f2   :  { %v3126_v1 = vunpack.i.h.bf16 %v3583_v38  ;;  %v3125_v0 = vunpack.i.l.bf16 %v3583_v38  ;;  %2975 = vmatprep.subr.msk.bf16.mxu0 %vm3412_vm6, %v2973_v14  ;;  %2981 = vmatprep.subr.msk.bf16.mxu1 %vm3412_vm6, %v2979_v17 }
 0x9f3   :  { %2978 = vmatpush3.bf16.xpose.msk.msra.mxu0 %vm3412_vm6, %v2973_v14  ;;  %2984 = vmatpush3.bf16.xpose.msk.msra.mxu1 %vm3412_vm6, %v2979_v17 }
 0x9f4   :  { %v2985_v39 = vpack.c.bf16 %v3126_v1, %v3125_v0 }
 0x9f6   :  { %2987 = vmatprep.subr.msk.bf16.mxu0 %vm3412_vm6, %v2985_v39 }
 0x9fb   :  { %v1336_v40 = vpop.permute.xlu0 %1335 }
 0x9fc   :  { %v1334_v41 = vpop.permute.xlu1 %1333 }
 0x9fd   :  { %2809 = vmatprep.mubr.msk.f32.mxu0 %vm199_vm5, %v1334_v41 }
 0x9fe   :  { %2810 = vmatmul.mubr.msk.f32.vlgmr.msra.gmra.mrb[10].mxu0 %vm199_vm5, %v1336_v40 }
 0x9ff   :  { %2990 = vmatpush3.bf16.xpose.msk.msra.mxu0 %vm3412_vm6, %v2985_v39  ;;  %v1340_v42 = vpop.permute.xlu0 %1339 }
 0xa00   :  { %v1338_v44 = vpop.permute.xlu1 %1337 }
 0xa01   :  { %2816 = vmatprep.mubr.msk.f32.mxu1 %vm199_vm5, %v1338_v44 }
 0xa02   :  { %2817 = vmatmul.mubr.msk.f32.vlgmr.msra.gmra.mrb[16].mxu1 %vm199_vm5, %v1340_v42 }
 0xa03   :  { %v1344_v48 = vpop.permute.xlu0 %1343 }
 0xa04   :  { %v1342_v45 = vpop.permute.xlu1 %1341 }
 0xa05   :  { %2823 = vmatprep.mubr.msk.f32.mxu0 %vm199_vm5, %v1342_v45 }
 0xa06   :  { %2824 = vmatmul.mubr.msk.f32.vlgmr.msra.gmra.mrb[12].mxu0 %vm199_vm5, %v1344_v48 }
 0xa07   :  { %v1362_v49 = vpop.permute.xlu0 %1361 }
 0xa08   :  { %v1360_v51 = vpop.permute.xlu1 %1359 }
 0xa5e   :  { %v2804_v52 = vpop.f32.mrb[14].mxu1 }
 0xa5f   :  { %v1445_v55 = vadd.f32 %v2804_v52, %v1362_v49  ;;  %v1439_v56 = vpop.f32.mrb[15].mxu1 }
 0xa60   :  { %v1440_v58 = vadd.f32 %v1439_v56, %v1360_v51 }
 0xa61   :  { %v1700_v54 = vsel %vm544_vm7, %v1445_v55, -inf }
 0xa62   :  { %1701 = vmax.xlane.f32.xlu0 %v1700_v54  ;;  %v1697_v59 = vsel %vm544_vm7, %v1440_v58, -inf }
 0xa63   :  { %1698 = vmax.xlane.f32.xlu1 %v1697_v59 }
 0xad1   :  { %v2811_v60 = vpop.f32.mrb[10].mxu0 }
 0xad2   :  { %v1528_v61 = vadd.f32 %v2811_v60, %v1362_v49  ;;  %v1522_v47 = vpop.f32.mrb[11].mxu0 }
 0xad3   :  { %v1523_v62 = vadd.f32 %v1522_v47, %v1360_v51 }
 0xad4   :  { %v1706_v63 = vsel %vm544_vm7, %v1528_v61, -inf }
 0xad5   :  { %1707 = vmax.xlane.f32.xlu0 %v1706_v63  ;;  %v2818_v2 = vpop.f32.mrb[16].mxu1  ;;  %v1703_v6 = vsel %vm544_vm7, %v1523_v62, -inf }
 0xad6   :  { %v1605_v3 = vpop.f32.mrb[17].mxu1  ;;  %v1611_v5 = vadd.f32 %v2818_v2, %v1362_v49 }
 0xad7   :  { %v1606_v4 = vadd.f32 %v1605_v3, %v1360_v51 }
 0xad8   :  { %v1712_v12 = vsel %vm544_vm7, %v1611_v5, -inf }
 0xad9   :  { %v2825_v7 = vpop.f32.mrb[12].mxu0  ;;  %1704 = vmax.xlane.f32.xlu0 %v1703_v6  ;;  %v1709_v8 = vsel %vm544_vm7, %v1606_v4, -inf }
 0xada   :  { %v1688_v9 = vpop.f32.mrb[13].mxu0  ;;  %1710 = vmax.xlane.f32.xlu1 %v1709_v8  ;;  %v1694_v11 = vadd.f32 %v2825_v7, %v1362_v49 }
 0xadb   :  { %v3610_v10 = vadd.f32 %v1688_v9, %v1360_v51 }
 0xadc   :  { %v1718_v18 = vsel %vm544_vm7, %v1694_v11, -inf }
 0xadd   :  { %1713 = vmax.xlane.f32.xlu0 %v1712_v12  ;;  %v1715_v13 = vsel %vm544_vm7, %v3610_v10, -inf }
 0xade   :  { %1716 = vmax.xlane.f32.xlu1 %v1715_v13 }
 0xae1   :  { %1719 = vmax.xlane.f32.xlu0 %v1718_v18 }
 0xaef   :  { %v1702_v20 = vpop.xlane.xlu0 %1701  ;;  %3128 = vrot.lane.b32.xlu1 %v3553_v46, %s3319_s28 }
 0xaf0   :  { %v1722_v21 = vsub.f32 %v1445_v55, %v1702_v20  ;;  %v1699_v19 = vpop.xlane.xlu1 %1698 }
 0xaf1   :  { %v1721_v22 = vsub.f32 %v1440_v58, %v1699_v19 }
 0xaf2   :  { %v1731_v16 = vmul.f32 1.442695, %v1722_v21 }
 0xaf3   :  { %v1729_v25 = vmul.f32 1.442695, %v1721_v22 }
 0xaf4   :  { %3225 = vpow2.f32 %v1731_v16 }
 0xaf5   :  { %3227 = vpow2.f32 %v1729_v25 }
 0xafe   :  { %v3618_v23 = vpop.eup %3225 }
 0xaff   :  { %v1748_v24 = vsel %vm544_vm7, %v3618_v23, 0.0  ;;  %v3228_v26 = vpop.eup %3227 }
 0xb00   :  { %1749 = vadd.xlane.f32.xlu0 %v1748_v24  ;;  %v1745_v27 = vsel %vm544_vm7, %v3228_v26, 0.0 }
 0xb13   :  { %1746 = vadd.xlane.f32.xlu1 %v1745_v27 }
 0xb62   :  { %v1708_v28 = vpop.xlane.xlu0 %1707 }
 0xb63   :  { %v1724_v29 = vsub.f32 %v1528_v61, %v1708_v28 }
 0xb65   :  { %v1735_v46 = vmul.f32 1.442695, %v1724_v29 }
 0xb66   :  { %v1705_v50 = vpop.xlane.xlu0 %1704 }
 0xb67   :  { %3229 = vpow2.f32 %v1735_v46  ;;  %v1723_v30 = vsub.f32 %v1523_v62, %v1705_v50  ;;  %v1711_v31 = vpop.xlane.xlu1 %1710 }
 0xb68   :  { %v1725_v33 = vsub.f32 %v1606_v4, %v1711_v31 }
 0xb69   :  { %v1733_v35 = vmul.f32 1.442695, %v1723_v30 }
 0xb6a   :  { %v1737_v36 = vmul.f32 1.442695, %v1725_v33  ;;  %v1714_v37 = vpop.xlane.xlu0 %1713 }
 0xb6b   :  { %3231 = vpow2.f32 %v1733_v35  ;;  %v1726_v14 = vsub.f32 %v1611_v5, %v1714_v37  ;;  %v1717_v17 = vpop.xlane.xlu1 %1716 }
 0xb6c   :  { %3233 = vpow2.f32 %v1737_v36  ;;  %v1727_v61 = vsub.f32 %v3610_v10, %v1717_v17 }
 0xb6d   :  { %v1739_v1 = vmul.f32 1.442695, %v1726_v14 }
 0xb6e   :  { %v1720_v0 = vpop.xlane.xlu0 %1719  ;;  %v1741_v62 = vmul.f32 1.442695, %v1727_v61 }
 0xb6f   :  { %3235 = vpow2.f32 %v1739_v1  ;;  %v1728_v39 = vsub.f32 %v1694_v11, %v1720_v0  ;;  %v3129_v40 = vpop.permute.xlu1 %3128 }
 0xb70   :  { %v3131_v41 = vunpack.i.h.bf16 %v3129_v40  ;;  %v3130_v42 = vunpack.i.l.bf16 %v3129_v40 }
 0xb71   :  { %v3623_v44 = vpop.eup %3229  ;;  %v1743_v45 = vmul.f32 1.442695, %v1728_v39 }
 0xb72   :  { %v2991_v48 = vpack.c.bf16 %v3131_v41, %v3130_v42  ;;  %v1754_v49 = vsel %vm544_vm7, %v3623_v44, 0.0 }
 0xb73   :  { %3237 = vpow2.f32 %v1743_v45  ;;  %1755 = vadd.xlane.f32.xlu0 %v1754_v49 }
 0xb74   :  { %2992 = vmatprep.subr.bf16.mxu1 %v2991_v48 }
 0xb75   :  { %v3232_v51 = vpop.eup %3231  ;;  %2994 = vmatpush3.bf16.msra.mxu1 %v2991_v48 }
 0xb76   :  { %v1751_v52 = vsel %vm544_vm7, %v3232_v51, 0.0  ;;  %v3234_v55 = vpop.eup %3233 }
 0xb77   :  { %1752 = vadd.xlane.f32.xlu1 %v1751_v52  ;;  %v1757_v54 = vsel %vm544_vm7, %v3234_v55, 0.0 }
 0xb79   :  { %v3236_v56 = vpop.eup %3235 }
 0xb7a   :  { %v1760_v58 = vsel %vm544_vm7, %v3236_v56, 0.0 }
 0xb7b   :  { %1761 = vadd.xlane.f32.xlu0 %v1760_v58  ;;  %1758 = vadd.xlane.f32.xlu1 %v1757_v54 }
 0xb7d   :  { %v3630_v59 = vpop.eup %3237 }
 0xb7e   :  { %v1766_v60 = vsel %vm544_vm7, %v3630_v59, 0.0 }
 0xb7f   :  { %1767 = vadd.xlane.f32.xlu0 %v1766_v60 }
 0xb8c   :  { %3138 = vrot.lane.b32.xlu1 %v3577_v43, %s3319_s28 }
 0xb8d   :  { %v1750_v47 = vpop.xlane.xlu0 %1749 }
 0xb8e   :  { %3239 = vrcp.f32 %v1750_v47 }
 0xb95   :  { %3133 = vrot.lane.b32.xlu0 %v3575_v32, %s3319_s28 }
 0xb98   :  { %v3240_v2 = vpop.eup %3239 }
 0xb99   :  { %v1772_v6 = vmul.f32 %v3240_v2, %v3618_v23  ;;  %3153 = vrot.lane.b32.xlu0 %v3533_v15, %s3321_s30 }
 0xba0   :  { %v1747_v63 = vpop.xlane.xlu1 %1746 }
 0xba1   :  { %3241 = vrcp.f32 %v1747_v63 }
 0xba2   :  { %3243 = vpow2.f32 %v1741_v62 }
 0xbab   :  { %v3242_v3 = vpop.eup %3241 }
 0xbac   :  { %v3244_v4 = vpop.eup %3243  ;;  %v1770_v5 = vmul.f32 %v3242_v3, %v3228_v26 }
 0xbad   :  { %v1763_v32 = vsel %vm544_vm7, %v3244_v4, 0.0 }
 0xbae   :  { %2830 = vmatprep.mubr.msk.f32.mxu1 %vm544_vm7, %v1770_v5 }
 0xbaf   :  { %2831 = vmatmul.mubr.msk.f32.vlgmr.msra.gmra.mrb[18].mxu1 %vm544_vm7, %v1772_v6 }
 0xbb0   :  { %1764 = vadd.xlane.f32.xlu1 %v1763_v32 }
 0xbc1   :  { %3143 = vrot.lane.b32.xlu1 %v3583_v38, %s3319_s28 }
 0xbc5   :  { %3148 = vrot.lane.b32.xlu1 %v3545_v53, %s3321_s30 }
 0xc00   :  { %v1756_v43 = vpop.xlane.xlu0 %1755 }
 0xc04   :  { %v1753_v7 = vpop.xlane.xlu1 %1752 }
 0xc05   :  { %3245 = vrcp.f32 %v1753_v7 }
 0xc06   :  { %3247 = vrcp.f32 %v1756_v43 }
 0xc08   :  { %v1762_v8 = vpop.xlane.xlu0 %1761  ;;  %v1759_v9 = vpop.xlane.xlu1 %1758 }
 0xc09   :  { %3249 = vrcp.f32 %v1762_v8 }
 0xc0a   :  { %3251 = vrcp.f32 %v1759_v9 }
 0xc0c   :  { %v1768_v10 = vpop.xlane.xlu0 %1767  ;;  %v3139_v11 = vpop.permute.xlu1 %3138 }
 0xc0d   :  { %v3141_v12 = vunpack.i.h.bf16 %v3139_v11  ;;  %v3140_v13 = vunpack.i.l.bf16 %v3139_v11  ;;  %3253 = vrcp.f32 %v1768_v10 }
 0xc0f   :  { %v3246_v18 = vpop.eup %3245  ;;  %v2999_v38 = vpack.c.bf16 %v3141_v12, %v3140_v13 }
 0xc10   :  { %v3134_v20 = vpop.permute.xlu0 %3133  ;;  %v1774_v21 = vmul.f32 %v3246_v18, %v3232_v51  ;;  %v3248_v15 = vpop.eup %3247 }
 0xc11   :  { %v3136_v16 = vunpack.i.h.bf16 %v3134_v20  ;;  %v3135_v19 = vunpack.i.l.bf16 %v3134_v20  ;;  %3000 = vmatprep.subr.bf16.mxu0 %v2999_v38  ;;  %v1776_v26 = vmul.f32 %v3248_v15, %v3623_v44  ;;  %v36_v20 = vld [vmem:[#allocation2 + $0x40] sm:$0xff]  ;;  %v39_v15 = vld [vmem:[#allocation2 + $0x58] sm:$0xff] }
 0xc12   :  { %2837 = vmatprep.mubr.msk.f32.mxu1 %vm544_vm7, %v1774_v21  ;;  %3002 = vmatpush3.bf16.msra.mxu0 %v2999_v38  ;;  %v37_v21 = vld [vmem:[#allocation2 + $0x48] sm:$0xff] }
 0xc13   :  { %v3250_v53 = vpop.eup %3249  ;;  %v2995_v22 = vpack.c.bf16 %v3136_v16, %v3135_v19  ;;  %v38_v16 = vld [vmem:[#allocation2 + $0x50] sm:$0xff]  ;;  %v3015_v19 = vpack.c.bf16 %v37_v21, %v36_v20 }
 0xc14   :  { %v3252_v23 = vpop.eup %3251  ;;  %v1780_v24 = vmul.f32 %v3250_v53, %v3236_v56  ;;  %v3154_v14 = vpop.permute.xlu0 %3153  ;;  %v3019_v53 = vpack.c.bf16 %v39_v15, %v38_v16 }
 0xc15   :  { %2996 = vmatprep.subr.bf16.mxu1 %v2995_v22  ;;  %v1778_v25 = vmul.f32 %v3252_v23, %v3234_v55  ;;  %v3156_v1 = vunpack.i.h.bf16 %v3154_v14  ;;  %v3155_v0 = vunpack.i.l.bf16 %v3154_v14  ;;  %v3162_v23 = vpack.i.bf16 %v39_v15, %v38_v16 }
 0xc16   :  { %2998 = vmatpush3.bf16.msra.mxu1 %v2995_v22  ;;  %v3157_v22 = vpack.i.bf16 %v37_v21, %v36_v20 }
 0xc17   :  { %2844 = vmatprep.mubr.msk.f32.mxu0 %vm544_vm7, %v1778_v25  ;;  %v3254_v30 = vpop.eup %3253  ;;  %v3011_v41 = vpack.c.bf16 %v3156_v1, %v3155_v0  ;;  %v45_v25 = vld [vmem:[#allocation2 + $0x68] sm:$0xff] }
 0xc18   :  { %2845 = vmatmul.mubr.msk.f32.vlgmr.msra.gmra.mrb[14].mxu0 %vm544_vm7, %v1780_v24  ;;  %v1784_v35 = vmul.f32 %v3254_v30, %v3630_v59  ;;  %v44_v24 = vld [vmem:[#allocation2 + $0x60] sm:$0xff] }
 0xc19   :  { %2838 = vmatmul.mubr.msk.f32.vlgmr.msra.gmra.mrb[20].mxu1 %vm544_vm7, %v1776_v26  ;;  %v3167_v26 = vpack.i.bf16 %v45_v25, %v44_v24 }
 0xc3d   :  { %v1765_v27 = vpop.xlane.xlu1 %1764 }
 0xc3e   :  { %3255 = vrcp.f32 %v1765_v27  ;;  %v46_v27 = vld [vmem:[#allocation2 + $0x70] sm:$0xff] }
 0xc41   :  { %v3144_v28 = vpop.permute.xlu1 %3143 }
 0xc42   :  { %v3146_v29 = vunpack.i.h.bf16 %v3144_v28  ;;  %v3145_v46 = vunpack.i.l.bf16 %v3144_v28  ;;  %v47_v28 = vld [vmem:[#allocation2 + $0x78] sm:$0xff] }
 0xc44   :  { %v3003_v50 = vpack.c.bf16 %v3146_v29, %v3145_v46  ;;  %v3172_v29 = vpack.i.bf16 %v47_v28, %v46_v27 }
 0xc45   :  { %v3149_v17 = vpop.permute.xlu1 %3148 }
 0xc46   :  { %3004 = vmatprep.subr.bf16.mxu1 %v3003_v50  ;;  %v3151_v39 = vunpack.i.h.bf16 %v3149_v17  ;;  %v3150_v40 = vunpack.i.l.bf16 %v3149_v17 }
 0xc47   :  { %3006 = vmatpush3.bf16.msra.mxu1 %v3003_v50 }
 0xc48   :  { %v3256_v31 = vpop.eup %3255  ;;  %v3007_v42 = vpack.c.bf16 %v3151_v39, %v3150_v40  ;;  %3016 = vmatprep.subr.bf16.mxu1 %v3015_v19 }
 0xc49   :  { %v1782_v33 = vmul.f32 %v3256_v31, %v3244_v4 }
 0xc4a   :  { %3008 = vmatprep.subr.bf16.mxu0 %v3007_v42 }
 0xc4b   :  { %2851 = vmatprep.mubr.msk.f32.mxu1 %vm544_vm7, %v1782_v33  ;;  %3010 = vmatpush3.bf16.msra.mxu0 %v3007_v42 }
 0xc4c   :  { %2852 = vmatmul.mubr.msk.f32.vlgmr.msra.gmra.mrb[22].mxu1 %vm544_vm7, %v1784_v35  ;;  %3012 = vmatprep.subr.bf16.mxu0 %v3011_v41 }
 0xc4d   :  { %3018 = vmatpush3.bf16.msra.mxu1 %v3015_v19 }
 0xc4e   :  { %3020 = vmatprep.subr.bf16.mxu1 %v3019_v53 }
 0xc4f   :  { %3014 = vmatpush3.bf16.msra.mxu0 %v3011_v41 }
 0xc51   :  { %3022 = vmatpush3.bf16.msra.mxu1 %v3019_v53 }
 0xc82   :  { %v2832_v36 = vpop.f32.mrb[18].mxu1 }
 0xc83   :  { %v1863_v37 = vpop.f32.mrb[19].mxu1 }
 0xceb   :  { %v2846_v44 = vpop.f32.mrb[14].mxu0 }
 0xcec   :  { %v2037_v45 = vpop.f32.mrb[15].mxu0  ;;  %v2839_v48 = vpop.f32.mrb[20].mxu1 }
 0xced   :  { %2137 = vrot.lane.b32.xlu0 %v2839_v48, %s3315_s20  ;;  %v1950_v49 = vpop.f32.mrb[21].mxu1 }
 0xcee   :  { %2135 = vrot.lane.b32.xlu1 %v1950_v49, %s3315_s20 }
 0xcf1   :  { %2145 = vrot.lane.b32.xlu0 %v2846_v44, %s3322_s3 }
 0xcf2   :  { %2143 = vrot.lane.b32.xlu1 %v2037_v45, %s3322_s3 }
 0xd1f   :  { %v2853_v51 = vpop.f32.mrb[22].mxu1 }
 0xd20   :  { %2153 = vrot.lane.b32.xlu0 %v2853_v51, %s3323_s4  ;;  %v2124_v52 = vpop.f32.mrb[23].mxu1 }
 0xd21   :  { %2151 = vrot.lane.b32.xlu1 %v2124_v52, %s3323_s4 }
 0xd5f   :  { %v2138_v55 = vpop.permute.xlu0 %2137 }
 0xd60   :  { %v2136_v56 = vpop.permute.xlu1 %2135  ;;  %v2158_v61 = vsel %vm199_vm5, %v2832_v36, %v2138_v55 }
 0xd61   :  { %v2157_v59 = vsel %vm199_vm5, %v1863_v37, %v2136_v56 }
 0xd63   :  { %v2146_v58 = vpop.permute.xlu0 %2145 }
 0xd64   :  { %v2144_v54 = vpop.permute.xlu1 %2143  ;;  %v2160_v63 = vsel %vm544_vm7, %v2158_v61, %v2146_v58 }
 0xd65   :  { %v2159_v47 = vsel %vm544_vm7, %v2157_v59, %v2144_v54 }
 0xd92   :  { %v2154_v60 = vpop.permute.xlu0 %2153 }
 0xd93   :  { %v2152_v62 = vpop.permute.xlu1 %2151  ;;  %v2162_v3 = vsel %vm1009_vm8, %v2160_v63, %v2154_v60 }
 0xd94   :  { %v2161_v2 = vsel %vm1009_vm8, %v2159_v47, %v2152_v62 }
 0xd95   :  { %2862 = vmatprep.mubr.msk.f32.mxu0 %vm50_vm0, %v2161_v2 }
 0xd96   :  { %2863 = vmatmul.mubr.msk.f32.vlgmr.msra.gmra.mrb[16].mxu0 %vm50_vm0, %v2162_v3 }
 0xe69   :  { %v2864_v4 = vpop.f32.mrb[16].mxu0 }
 0xe6a   :  { %v3672_v5 = vadd.f32 %v2864_v4, %v3524_v57  ;;  %v2247_v6 = vpop.f32.mrb[17].mxu0 }
 0xe6b   :  { %v3675_v32 = vadd.f32 %v2247_v6, %v3527_v34 }
 0xe6c   :  { %v2261_v43 = vsel %vm50_vm0, %v3672_v5, 0.0 }
 0xe6d   :  { %2262 = vadd.xlane.f32.xlu0 %v2261_v43  ;;  %v2258_v7 = vsel %vm50_vm0, %v3675_v32, 0.0  ;;  %v2582_v43 = vld [vmem:[#allocation2 + $0x60] ss:$0 sm:$0xff] }
 0xe6e   :  { %2259 = vadd.xlane.f32.xlu1 %v2258_v7 }
 0xe7f   :  { %3158 = vrot.lane.b32.xlu1 %v3157_v22, %s3320_s29 }
 0xe83   :  { %3168 = vrot.lane.b32.xlu1 %v3167_v26, %s3320_s29 }
 0xe87   :  { %3173 = vrot.lane.b32.xlu1 %v3172_v29, %s3320_s29 }
 0xefa   :  { %v2263_v8 = vpop.xlane.xlu0 %2262 }
 0xefb   :  { %v2265_v9 = vmul.f32 0.03125, %v2263_v8  ;;  %v2260_v10 = vpop.xlane.xlu1 %2259 }
 0xefc   :  { %v2264_v11 = vmul.f32 0.03125, %v2260_v10 }
 0xefd   :  { %v3682_v12 = vsub.f32 %v3672_v5, %v2265_v9 }
 0xefe   :  { %v3685_v57 = vsub.f32 %v3675_v32, %v2264_v11 }
 0xeff   :  { %v2269_v18 = vmul.f32 %v3682_v12, %v3682_v12  ;;  %v3159_v44 = vpop.permute.xlu1 %3158 }
 0xf00   :  { %v2268_v34 = vmul.f32 %v3685_v57, %v3685_v57  ;;  %v3161_v48 = vunpack.i.h.bf16 %v3159_v44  ;;  %v3160_v49 = vunpack.i.l.bf16 %v3159_v44 }
 0xf01   :  { %v2273_v38 = vsel %vm50_vm0, %v2269_v18, 0.0 }
 0xf02   :  { %v2270_v13 = vsel %vm50_vm0, %v2268_v34, 0.0  ;;  %v3023_v55 = vpack.c.bf16 %v3161_v48, %v3160_v49  ;;  %v2585_v34 = vld [vmem:[#allocation2 + $0x61] ss:$0 sm:$0xff] }
 0xf03   :  { %2271 = vadd.xlane.f32.xlu0 %v2270_v13  ;;  %v3169_v58 = vpop.permute.xlu1 %3168 }
 0xf04   :  { %3024 = vmatprep.subr.bf16.mxu0 %v3023_v55  ;;  %v3171_v59 = vunpack.i.h.bf16 %v3169_v58  ;;  %v3170_v60 = vunpack.i.l.bf16 %v3169_v58 }
 0xf05   :  { %3026 = vmatpush3.bf16.msra.mxu0 %v3023_v55 }
 0xf06   :  { %v3031_v47 = vpack.c.bf16 %v3171_v59, %v3170_v60 }
 0xf07   :  { %2274 = vadd.xlane.f32.xlu0 %v2273_v38  ;;  %v3174_v62 = vpop.permute.xlu1 %3173 }
 0xf08   :  { %v3176_v2 = vunpack.i.h.bf16 %v3174_v62  ;;  %v3175_v3 = vunpack.i.l.bf16 %v3174_v62 }
 0xf0a   :  { %v3035_v6 = vpack.c.bf16 %v3176_v2, %v3175_v3 }
 0xf1d   :  { %3163 = vrot.lane.b32.xlu0 %v3162_v23, %s3320_s29 }
 0xf90   :  { %v2272_v46 = vpop.xlane.xlu0 %2271 }
 0xf91   :  { %v2276_v50 = vmul.f32 0.032258064, %v2272_v46 }
 0xf93   :  { %3257 = vrsqrt.f32 %v2276_v50  ;;  %vm2280_vm13 = vcmp.eq.f32.partialorder %v2276_v50, inf  ;;  %v2283_v36 = vand.u32 2147483648, %v2276_v50  ;;  %vm2282_vm14 = vcmp.eq.f32.partialorder %v2276_v50, 0.0 }
 0xf94   :  { %v2275_v30 = vpop.xlane.xlu0 %2274 }
 0xf95   :  { %v2277_v31 = vmul.f32 0.032258064, %v2275_v30 }
 0xf97   :  { %3259 = vrsqrt.f32 %v2277_v31  ;;  %vm2287_vm15 = vcmp.eq.f32.partialorder %v2277_v31, inf  ;;  %v2290_v39 = vand.u32 2147483648, %v2277_v31  ;;  %vm2289_vm1 = vcmp.eq.f32.partialorder %v2277_v31, 0.0 }
 0xf98   :  { %v3164_v45 = vpop.permute.xlu0 %3163 }
 0xf99   :  { %v3166_v51 = vunpack.i.h.bf16 %v3164_v45  ;;  %v3165_v52 = vunpack.i.l.bf16 %v3164_v45 }
 0xf9b   :  { %v3027_v56 = vpack.c.bf16 %v3166_v51, %v3165_v52 }
 0xf9d   :  { %v3258_v33 = vpop.eup %3257  ;;  %3028 = vmatprep.subr.bf16.mxu0 %v3027_v56 }
 0xf9e   :  { %v2279_v35 = vmul.f32 %v3258_v33, %v2276_v50  ;;  %3030 = vmatpush3.bf16.msra.mxu0 %v3027_v56 }
 0xf9f   :  { %3032 = vmatprep.subr.bf16.mxu0 %v3031_v47 }
 0xfa0   :  { %v2281_v37 = vsel %vm2280_vm13, %v2276_v50, %v2279_v35 }
 0xfa1   :  { %v3260_v14 = vpop.eup %3259  ;;  %v2284_v17 = vsel %vm2282_vm14, %v2283_v36, %v2281_v37 }
 0xfa2   :  { %v2286_v1 = vmul.f32 %v3260_v14, %v2277_v31  ;;  %v2292_v0 = vadd.f32 1e-06, %v2284_v17  ;;  %3034 = vmatpush3.bf16.msra.mxu0 %v3031_v47 }
 0xfa3   :  { %3036 = vmatprep.subr.bf16.mxu0 %v3035_v6 }
 0xfa4   :  { %v2288_v40 = vsel %vm2287_vm15, %v2277_v31, %v2286_v1  ;;  %3261 = vrcp.f32 %v2292_v0 }
 0xfa5   :  { %v2291_v41 = vsel %vm2289_vm1, %v2290_v39, %v2288_v40 }
 0xfa6   :  { %v2293_v42 = vadd.f32 1e-06, %v2291_v41  ;;  %3038 = vmatpush3.bf16.msra.mxu0 %v3035_v6 }
 0xfa8   :  { %3263 = vrcp.f32 %v2293_v42 }
 0xfae   :  { %v3262_v54 = vpop.eup %3261 }
 0xfaf   :  { %v2295_v61 = vmul.f32 %v3262_v54, %v3685_v57 }
 0xfb1   :  { %2873 = vmatprep.mubr.msk.f32.mxu1 %vm50_vm0, %v2295_v61 }
 0xfb2   :  { %v3264_v63 = vpop.eup %3263 }
 0xfb3   :  { %v2297_v4 = vmul.f32 %v3264_v63, %v3682_v12 }
 0xfb5   :  { %2874 = vmatmul.mubr.msk.f32.vlgmr.msra.gmra.mrb[24].mxu1 %vm50_vm0, %v2297_v4 }
0x1088   :  { %v2875_v7 = vpop.f32.mrb[24].mxu1 }
0x1089   :  { %v2380_v8 = vadd.f32 %v2875_v7, %v2582_v43  ;;  %v2374_v9 = vpop.f32.mrb[25].mxu1 }
0x108a   :  { %v2375_v10 = vadd.f32 %v2582_v43, %v2374_v9 }
0x108b   :  { %v2384_v57 = vmax.f32 %v2380_v8, 0.0 }
0x108c   :  { %v2383_v11 = vmax.f32 %v2375_v10, 0.0 }
0x108e   :  { %2892 = vmatprep.mubr.msk.f32.mxu0 %vm2421_vm2, %v2383_v11 }
0x108f   :  { %2893 = vmatmul.mubr.msk.f32.vlgmr.msra.gmra.mrb[18].mxu0 %vm2421_vm2, %v2384_v57 }
0x1162   :  { %v2894_v12 = vpop.f32.mrb[18].mxu0 }
0x1163   :  { %v2500_v13 = vadd.f32 %v2894_v12, %v2585_v34  ;;  %v2494_v18 = vpop.f32.mrb[19].mxu0 }
0x1164   :  { %v2495_v38 = vadd.f32 %v2585_v34, %v2494_v18 }
0x1165   :  { %v2504_v20 = vadd.f32 %v2500_v13, %v3672_v5 }
0x1166   :  { %v2503_v21 = vadd.f32 %v2495_v38, %v3675_v32 }
0x1167   :  { %2506 = vst.msk [vmem:[#allocation5 + $0x8] sm:$0xff] %vm50_vm0, %v2504_v20 }
0x1168   :  { %2505 = vst.msk [vmem:[#allocation5] sm:$0xff] %vm50_vm0, %v2503_v21 }
0x1169   :  { %3298 = shalt.err (!%p3295_p12)
}
0x116a   :  { %s3299_s11 = scalar_lea.hbm %s3722_s2, 256 }
0x116b   :  { %p3300_p13 = scmp.ne.s32.totalorder %s3722_s2, %s3299_s11  ;;  %p3303_p0 = scmp.lt.u32.totalorder %s3299_s11, %s3722_s2 }
0x116d   :  { %p3305_p1 = pnand %p3303_p0, %p3300_p13 }
0x116f   :  { %3308 = shalt.err (!%p3305_p1)
}
0x1170   :  { %2518 = dma.vmem_to_hbm [thread:$0]  %s2513_s7, 256, %s3722_s2, [#allocation4], %s3314_s19, %s3314_s19, %s3315_s20  }
0x1171   :  { %3311 = dma.done.wait [#allocation4], 256  }
0x1172   :  { %3312 = vsyncadd [#allocation4], 4294967040 }
0x1173   :  { %2522 = vsyncpa [#allocation3], 1 }
0x1174   :  { %2523 = vsyncpa [#allocation4], 1 }

</bundles_post_ra>
